<compile_context>
chip_gen: v7x
topology: tpu7x:2x2x1
jax: 0.10.0
libtpu: 0.0.40
codegen_flags: <defaults>
</compile_context>

<pallas_src>
import jax
import jax.numpy as jnp
from jax.experimental import pallas as pl
from jax.experimental.pallas import tpu as pltpu

# ---- module "args" (small shapes implied by the forward) --------------------
B = 2             # batch of graphs
N = 8             # number of nodes / sequence length
H = 32            # args.hidden_dim
NUM_HEADS = 4
HEAD_DIM = H // NUM_HEADS
MLP_DIM = 4 * H
NUM_LAYERS = 2
LN_EPS = 1e-5     # torch.nn.LayerNorm default

_SQRT1_2 = 0.7071067811865476

PARAM_ORDER = ("ln1_w", "ln1_b", "wq", "wk", "wv", "bq", "bk", "bv",
               "wo", "bo", "ln2_w", "ln2_b", "w1", "b1", "w2", "b2",
               "lnf_w", "lnf_b")


# ----------------------------- in-kernel helpers ----------------------------
def _layernorm(x, w, b):
    mu = jnp.mean(x, axis=-1, keepdims=True)
    var = jnp.mean((x - mu) ** 2, axis=-1, keepdims=True)
    return (x - mu) * jax.lax.rsqrt(var + LN_EPS) * w + b


def _erf_approx(x):
    # Abramowitz & Stegun 7.1.26 polynomial, |err| < 1.5e-7.  Matches torch's
    # exact (erf) GELU much more closely than the tanh approximation while
    # only using VPU + EUP(exp) ops that are guaranteed to lower.
    p = 0.3275911
    a1, a2, a3, a4, a5 = (0.254829592, -0.284496736, 1.421413741,
                          -1.453152027, 1.061405429)
    ax = jnp.abs(x)
    t = 1.0 / (1.0 + p * ax)
    poly = ((((a5 * t + a4) * t + a3) * t + a2) * t + a1) * t
    e = 1.0 - poly * jnp.exp(-ax * ax)
    return jnp.where(x >= 0, e, -e)


def _gelu(x):
    # torch.nn.GELU(approximate='none') semantics.
    # TODO(synk): switch to the tanh form if the reference Encoder uses it.
    return 0.5 * x * (1.0 + _erf_approx(x * _SQRT1_2))


# ------------------------------ fused kernel --------------------------------
def transformer_kernel(x_ref, ln1w_ref, ln1b_ref, wq_ref, wk_ref, wv_ref,
                       bq_ref, bk_ref, bv_ref, wo_ref, bo_ref,
                       ln2w_ref, ln2b_ref, w1_ref, b1_ref, w2_ref, b2_ref,
                       lnfw_ref, lnfb_ref, o_ref):
    """One batch element: NUM_LAYERS pre-LN blocks + final LayerNorm, fused."""
    x = x_ref[0].astype(jnp.float32)                                # (N, H)
    scale = 1.0 / float(HEAD_DIM) ** 0.5

    for l in range(NUM_LAYERS):                                     # static unroll
        # ---- multi-head self-attention (pre-LN); heads batched on the MXU ----
        xn = _layernorm(x, ln1w_ref[l], ln1b_ref[l])                # (N, H)
        xb = jnp.broadcast_to(xn, (NUM_HEADS, N, H))                # (h, N, H)

        q = jnp.einsum('hnc,hcd->hnd', xb, wq_ref[l],
                       preferred_element_type=jnp.float32) + bq_ref[l]
        k = jnp.einsum('hnc,hcd->hnd', xb, wk_ref[l],
                       preferred_element_type=jnp.float32) + bk_ref[l]
        v = jnp.einsum('hnc,hcd->hnd', xb, wv_ref[l],
                       preferred_element_type=jnp.float32) + bv_ref[l]

        s = jnp.einsum('hqd,hkd->hqk', q, k,
                       preferred_element_type=jnp.float32) * scale  # (h, N, N)
        s = s - jnp.max(s, axis=-1, keepdims=True)
        p = jnp.exp(s)
        p = p * pl.reciprocal(jnp.sum(p, axis=-1, keepdims=True), approx=True)

        ctx = jnp.einsum('hqk,hkd->hqd', p, v,
                         preferred_element_type=jnp.float32)        # (h, N, dh)
        # per-head output projection then reduce over heads: (h,N,H) -> (N,H)
        attn = jnp.einsum('hqd,hdj->hqj', ctx, wo_ref[l],
                          preferred_element_type=jnp.float32).sum(axis=0)
        x = x + attn + bo_ref[l]

        # ---- MLP block (pre-LN) ----
        xn2 = _layernorm(x, ln2w_ref[l], ln2b_ref[l])
        hdn = jnp.dot(xn2, w1_ref[l],
                      preferred_element_type=jnp.float32) + b1_ref[l]
        hdn = _gelu(hdn)
        x = x + jnp.dot(hdn, w2_ref[l],
                        preferred_element_type=jnp.float32) + b2_ref[l]

    # ---- final LayerNorm ----
    x = _layernorm(x, lnfw_ref[...], lnfb_ref[...])
    o_ref[0] = x.astype(o_ref.dtype)


# ------------------------------ host wrappers --------------------------------
def _full_spec(p):
    nd = p.ndim
    return pl.BlockSpec(p.shape, lambda b, _nd=nd: (0,) * _nd)


@jax.jit
def transformer_forward(embeddings, params):
    """forward(): embedding_output = self.embeddings; encoded = encoder(...)"""
    flat = tuple(params[name] for name in PARAM_ORDER)
    tok_spec = pl.BlockSpec((1, N, H), lambda b: (b, 0, 0))
    return pl.pallas_call(
        transformer_kernel,
        out_shape=jax.ShapeDtypeStruct(embeddings.shape, embeddings.dtype),
        grid=(B,),
        in_specs=[tok_spec] + [_full_spec(p) for p in flat],
        out_specs=tok_spec,
        compiler_params=pltpu.CompilerParams(
            dimension_semantics=("parallel",)),   # one TC per batch row on v7x
    )(embeddings, *flat)


# ------------------------------ parameters -----------------------------------
def _split_heads_w(w):   # (H, H_out) columns -> (NUM_HEADS, H, HEAD_DIM)
    return jnp.transpose(w.reshape(H, NUM_HEADS, HEAD_DIM), (1, 0, 2))


def _split_heads_b(b):   # (H,) -> (NUM_HEADS, 1, HEAD_DIM)
    return b.reshape(NUM_HEADS, HEAD_DIM)[:, None, :]


def init_params(key):
    """Deterministic synthetic parameters, pre-arranged head-major & stacked."""
    acc = {name: [] for name in PARAM_ORDER if not name.startswith("lnf")}
    keys = jax.random.split(key, 4 * NUM_LAYERS)
    for l in range(NUM_LAYERS):
        kqkv, ko, k1, k2 = keys[4 * l: 4 * l + 4]
        wqkv = 0.02 * jax.random.normal(kqkv, (H, 3 * H), jnp.float32)
        bqkv = jnp.zeros((3 * H,), jnp.float32)
        wo = 0.02 * jax.random.normal(ko, (H, H), jnp.float32)

        acc["ln1_w"].append(jnp.ones((1, H), jnp.float32))
        acc["ln1_b"].append(jnp.zeros((1, H), jnp.float32))
        acc["wq"].append(_split_heads_w(wqkv[:, 0 * H:1 * H]))
        acc["wk"].append(_split_heads_w(wqkv[:, 1 * H:2 * H]))
        acc["wv"].append(_split_heads_w(wqkv[:, 2 * H:3 * H]))
        acc["bq"].append(_split_heads_b(bqkv[0 * H:1 * H]))
        acc["bk"].append(_split_heads_b(bqkv[1 * H:2 * H]))
        acc["bv"].append(_split_heads_b(bqkv[2 * H:3 * H]))
        acc["wo"].append(wo.reshape(NUM_HEADS, HEAD_DIM, H))
        acc["bo"].append(jnp.zeros((1, H), jnp.float32))
        acc["ln2_w"].append(jnp.ones((1, H), jnp.float32))
        acc["ln2_b"].append(jnp.zeros((1, H), jnp.float32))
        acc["w1"].append(0.02 * jax.random.normal(k1, (H, MLP_DIM), jnp.float32))
        acc["b1"].append(jnp.zeros((1, MLP_DIM), jnp.float32))
        acc["w2"].append(0.02 * jax.random.normal(k2, (MLP_DIM, H), jnp.float32))
        acc["b2"].append(jnp.zeros((1, H), jnp.float32))

    params = {name: jnp.stack(vals, axis=0) for name, vals in acc.items()}
    params["lnf_w"] = jnp.ones((1, H), jnp.float32)
    params["lnf_b"] = jnp.zeros((1, H), jnp.float32)
    return params


# ------------------------------ pure-JAX reference ---------------------------
def transformer_reference(x, params):
    def ln(v, w, b):
        mu = v.mean(-1, keepdims=True)
        var = ((v - mu) ** 2).mean(-1, keepdims=True)
        return (v - mu) * jax.lax.rsqrt(var + LN_EPS) * w + b

    scale = 1.0 / float(HEAD_DIM) ** 0.5
    for l in range(NUM_LAYERS):
        xn = ln(x, params["ln1_w"][l], params["ln1_b"][l])
        q = jnp.einsum('bnc,hcd->bhnd', xn, params["wq"][l]) + params["bq"][l]
        k = jnp.einsum('bnc,hcd->bhnd', xn, params["wk"][l]) + params["bk"][l]
        v = jnp.einsum('bnc,hcd->bhnd', xn, params["wv"][l]) + params["bv"][l]
        s = jnp.einsum('bhqd,bhkd->bhqk', q, k) * scale
        p = jax.nn.softmax(s, axis=-1)
        ctx = jnp.einsum('bhqk,bhkd->bhqd', p, v)
        attn = jnp.einsum('bhqd,hdj->bqj', ctx, params["wo"][l]) + params["bo"][l]
        x = x + attn
        xn2 = ln(x, params["ln2_w"][l], params["ln2_b"][l])
        hdn = jnp.dot(xn2, params["w1"][l]) + params["b1"][l]
        hdn = 0.5 * hdn * (1.0 + jax.scipy.special.erf(hdn * _SQRT1_2))
        x = x + jnp.dot(hdn, params["w2"][l]) + params["b2"][l]
    return ln(x, params["lnf_w"], params["lnf_b"])


if __name__ == "__main__":
    key = jax.random.PRNGKey(0)
    k_emb, k_par = jax.random.split(key)

    # The module's learned embedding table acts as the "input" to the encoder.
    embeddings = 0.02 * jax.random.normal(k_emb, (B, N, H), jnp.float32)
    params = init_params(k_par)

    encoded = transformer_forward(embeddings, params)
    jax.block_until_ready(encoded)

    ref = transformer_reference(embeddings, params)
    assert encoded.shape == (B, N, H)
    assert jnp.all(jnp.isfinite(encoded))
    assert jnp.allclose(encoded, ref, atol=1e-2, rtol=1e-2)
    print("KERNEL_OK")
</pallas_src>

<mosaic_0001>
module attributes {stable_mosaic.version = 11 : i64} {
  func.func @transformer_kernel(%arg0: i32, %arg1: memref<1x8x32xf32, #tpu.memory_space<vmem>>, %arg2: memref<2x1x32xf32, #tpu.memory_space<vmem>>, %arg3: memref<2x1x32xf32, #tpu.memory_space<vmem>>, %arg4: memref<2x4x32x8xf32, #tpu.memory_space<vmem>>, %arg5: memref<2x4x32x8xf32, #tpu.memory_space<vmem>>, %arg6: memref<2x4x32x8xf32, #tpu.memory_space<vmem>>, %arg7: memref<2x4x1x8xf32, #tpu.memory_space<vmem>>, %arg8: memref<2x4x1x8xf32, #tpu.memory_space<vmem>>, %arg9: memref<2x4x1x8xf32, #tpu.memory_space<vmem>>, %arg10: memref<2x4x8x32xf32, #tpu.memory_space<vmem>>, %arg11: memref<2x1x32xf32, #tpu.memory_space<vmem>>, %arg12: memref<2x1x32xf32, #tpu.memory_space<vmem>>, %arg13: memref<2x1x32xf32, #tpu.memory_space<vmem>>, %arg14: memref<2x32x128xf32, #tpu.memory_space<vmem>>, %arg15: memref<2x1x128xf32, #tpu.memory_space<vmem>>, %arg16: memref<2x128x32xf32, #tpu.memory_space<vmem>>, %arg17: memref<2x1x32xf32, #tpu.memory_space<vmem>>, %arg18: memref<1x32xf32, #tpu.memory_space<vmem>>, %arg19: memref<1x32xf32, #tpu.memory_space<vmem>>, %arg20: memref<1x8x32xf32, #tpu.memory_space<vmem>>) attributes {dimension_semantics = [#tpu.dimension_semantics<parallel>], iteration_bounds = array<i64: 2>, scalar_prefetch = 0 : i64, scratch_operands = 0 : i64, tpu.core_type = #tpu.core_type<tc>, window_params = [{transform_indices = @transform_0, window_bounds = array<i64: 1, 8, 32>}, {pipeline_mode = #tpu.pipeline_mode<synchronous>, transform_indices = @transform_1, window_bounds = array<i64: 2, 1, 32>}, {pipeline_mode = #tpu.pipeline_mode<synchronous>, transform_indices = @transform_2, window_bounds = array<i64: 2, 1, 32>}, {pipeline_mode = #tpu.pipeline_mode<synchronous>, transform_indices = @transform_3, window_bounds = array<i64: 2, 4, 32, 8>}, {pipeline_mode = #tpu.pipeline_mode<synchronous>, transform_indices = @transform_4, window_bounds = array<i64: 2, 4, 32, 8>}, {pipeline_mode = #tpu.pipeline_mode<synchronous>, transform_indices = @transform_5, window_bounds = array<i64: 2, 4, 32, 8>}, {pipeline_mode = #tpu.pipeline_mode<synchronous>, transform_indices = @transform_6, window_bounds = array<i64: 2, 4, 1, 8>}, {pipeline_mode = #tpu.pipeline_mode<synchronous>, transform_indices = @transform_7, window_bounds = array<i64: 2, 4, 1, 8>}, {pipeline_mode = #tpu.pipeline_mode<synchronous>, transform_indices = @transform_8, window_bounds = array<i64: 2, 4, 1, 8>}, {pipeline_mode = #tpu.pipeline_mode<synchronous>, transform_indices = @transform_9, window_bounds = array<i64: 2, 4, 8, 32>}, {pipeline_mode = #tpu.pipeline_mode<synchronous>, transform_indices = @transform_10, window_bounds = array<i64: 2, 1, 32>}, {pipeline_mode = #tpu.pipeline_mode<synchronous>, transform_indices = @transform_11, window_bounds = array<i64: 2, 1, 32>}, {pipeline_mode = #tpu.pipeline_mode<synchronous>, transform_indices = @transform_12, window_bounds = array<i64: 2, 1, 32>}, {pipeline_mode = #tpu.pipeline_mode<synchronous>, transform_indices = @transform_13, window_bounds = array<i64: 2, 32, 128>}, {pipeline_mode = #tpu.pipeline_mode<synchronous>, transform_indices = @transform_14, window_bounds = array<i64: 2, 1, 128>}, {pipeline_mode = #tpu.pipeline_mode<synchronous>, transform_indices = @transform_15, window_bounds = array<i64: 2, 128, 32>}, {pipeline_mode = #tpu.pipeline_mode<synchronous>, transform_indices = @transform_16, window_bounds = array<i64: 2, 1, 32>}, {pipeline_mode = #tpu.pipeline_mode<synchronous>, transform_indices = @transform_17, window_bounds = array<i64: 1, 32>}, {pipeline_mode = #tpu.pipeline_mode<synchronous>, transform_indices = @transform_18, window_bounds = array<i64: 1, 32>}, {transform_indices = @transform_19, window_bounds = array<i64: 1, 8, 32>}]} {
    %c0 = arith.constant 0 : index
    %c0_0 = arith.constant 0 : index
    %c0_1 = arith.constant 0 : index
    %0 = vector.load %arg1[%c0, %c0_0, %c0_1] : memref<1x8x32xf32, #tpu.memory_space<vmem>>, vector<1x8x32xf32>
    %1 = vector.shape_cast %0 : vector<1x8x32xf32> to vector<8x32xf32>
    %c0_2 = arith.constant 0 : index
    %c0_3 = arith.constant 0 : index
    %c0_4 = arith.constant 0 : index
    %2 = vector.load %arg2[%c0_2, %c0_3, %c0_4] : memref<2x1x32xf32, #tpu.memory_space<vmem>>, vector<1x1x32xf32>
    %3 = vector.shape_cast %2 : vector<1x1x32xf32> to vector<1x32xf32>
    %c0_5 = arith.constant 0 : index
    %c0_6 = arith.constant 0 : index
    %c0_7 = arith.constant 0 : index
    %4 = vector.load %arg3[%c0_5, %c0_6, %c0_7] : memref<2x1x32xf32, #tpu.memory_space<vmem>>, vector<1x1x32xf32>
    %5 = vector.shape_cast %4 : vector<1x1x32xf32> to vector<1x32xf32>
    %cst = arith.constant dense<0.000000e+00> : vector<8xf32>
    %6 = vector.multi_reduction <add>, %1, %cst [1] : vector<8x32xf32> to vector<8xf32>
    %7 = vector.shape_cast %6 : vector<8xf32> to vector<8x1xf32>
    %cst_8 = arith.constant 3.200000e+01 : f32
    %8 = vector.broadcast %cst_8 : f32 to vector<8x1xf32>
    %9 = arith.divf %7, %8 : vector<8x1xf32>
    %10 = vector.broadcast %9 : vector<8x1xf32> to vector<8x32xf32>
    %11 = arith.subf %1, %10 : vector<8x32xf32>
    %12 = arith.mulf %11, %11 : vector<8x32xf32>
    %cst_9 = arith.constant dense<0.000000e+00> : vector<8xf32>
    %13 = vector.multi_reduction <add>, %12, %cst_9 [1] : vector<8x32xf32> to vector<8xf32>
    %14 = vector.shape_cast %13 : vector<8xf32> to vector<8x1xf32>
    %cst_10 = arith.constant 3.200000e+01 : f32
    %15 = vector.broadcast %cst_10 : f32 to vector<8x1xf32>
    %16 = arith.divf %14, %15 : vector<8x1xf32>
    %17 = vector.broadcast %9 : vector<8x1xf32> to vector<8x32xf32>
    %18 = arith.subf %1, %17 : vector<8x32xf32>
    %cst_11 = arith.constant 9.99999974E-6 : f32
    %19 = vector.broadcast %cst_11 : f32 to vector<8x1xf32>
    %20 = arith.addf %16, %19 : vector<8x1xf32>
    %21 = math.rsqrt %20 : vector<8x1xf32>
    %22 = vector.broadcast %21 : vector<8x1xf32> to vector<8x32xf32>
    %23 = arith.mulf %18, %22 : vector<8x32xf32>
    %24 = vector.broadcast %3 : vector<1x32xf32> to vector<8x32xf32>
    %25 = arith.mulf %23, %24 : vector<8x32xf32>
    %26 = vector.broadcast %5 : vector<1x32xf32> to vector<8x32xf32>
    %27 = arith.addf %25, %26 : vector<8x32xf32>
    %28 = vector.shape_cast %27 : vector<8x32xf32> to vector<1x8x32xf32>
    %29 = vector.broadcast %28 : vector<1x8x32xf32> to vector<4x8x32xf32>
    %c0_12 = arith.constant 0 : index
    %c0_13 = arith.constant 0 : index
    %c0_14 = arith.constant 0 : index
    %c0_15 = arith.constant 0 : index
    %30 = vector.load %arg4[%c0_12, %c0_13, %c0_14, %c0_15] : memref<2x4x32x8xf32, #tpu.memory_space<vmem>>, vector<1x4x32x8xf32>
    %31 = vector.shape_cast %30 : vector<1x4x32x8xf32> to vector<4x32x8xf32>
    "tpu.trace_start"() <{level = 10 : i32, message = "hnc,hcd->hnd"}> : () -> ()
    %cst_16 = arith.constant dense<0.000000e+00> : vector<4x8x8xf32>
    %32 = tpu.matmul %29, %31, %cst_16 {dimension_numbers = #tpu.dot_dimension_numbers<[2], [1], [1], [2], [0, 0, 0, 1, 1, 2], [0], [0]>} : vector<4x8x32xf32>, vector<4x32x8xf32>, vector<4x8x8xf32> -> vector<4x8x8xf32>
    "tpu.trace_stop"() : () -> ()
    %c0_17 = arith.constant 0 : index
    %c0_18 = arith.constant 0 : index
    %c0_19 = arith.constant 0 : index
    %c0_20 = arith.constant 0 : index
    %33 = vector.load %arg7[%c0_17, %c0_18, %c0_19, %c0_20] : memref<2x4x1x8xf32, #tpu.memory_space<vmem>>, vector<1x4x1x8xf32>
    %34 = vector.shape_cast %33 : vector<1x4x1x8xf32> to vector<4x1x8xf32>
    %35 = vector.broadcast %34 : vector<4x1x8xf32> to vector<4x8x8xf32>
    %36 = arith.addf %32, %35 : vector<4x8x8xf32>
    %c0_21 = arith.constant 0 : index
    %c0_22 = arith.constant 0 : index
    %c0_23 = arith.constant 0 : index
    %c0_24 = arith.constant 0 : index
    %37 = vector.load %arg5[%c0_21, %c0_22, %c0_23, %c0_24] : memref<2x4x32x8xf32, #tpu.memory_space<vmem>>, vector<1x4x32x8xf32>
    %38 = vector.shape_cast %37 : vector<1x4x32x8xf32> to vector<4x32x8xf32>
    "tpu.trace_start"() <{level = 10 : i32, message = "hnc,hcd->hnd"}> : () -> ()
    %cst_25 = arith.constant dense<0.000000e+00> : vector<4x8x8xf32>
    %39 = tpu.matmul %29, %38, %cst_25 {dimension_numbers = #tpu.dot_dimension_numbers<[2], [1], [1], [2], [0, 0, 0, 1, 1, 2], [0], [0]>} : vector<4x8x32xf32>, vector<4x32x8xf32>, vector<4x8x8xf32> -> vector<4x8x8xf32>
    "tpu.trace_stop"() : () -> ()
    %c0_26 = arith.constant 0 : index
    %c0_27 = arith.constant 0 : index
    %c0_28 = arith.constant 0 : index
    %c0_29 = arith.constant 0 : index
    %40 = vector.load %arg8[%c0_26, %c0_27, %c0_28, %c0_29] : memref<2x4x1x8xf32, #tpu.memory_space<vmem>>, vector<1x4x1x8xf32>
    %41 = vector.shape_cast %40 : vector<1x4x1x8xf32> to vector<4x1x8xf32>
    %42 = vector.broadcast %41 : vector<4x1x8xf32> to vector<4x8x8xf32>
    %43 = arith.addf %39, %42 : vector<4x8x8xf32>
    %c0_30 = arith.constant 0 : index
    %c0_31 = arith.constant 0 : index
    %c0_32 = arith.constant 0 : index
    %c0_33 = arith.constant 0 : index
    %44 = vector.load %arg6[%c0_30, %c0_31, %c0_32, %c0_33] : memref<2x4x32x8xf32, #tpu.memory_space<vmem>>, vector<1x4x32x8xf32>
    %45 = vector.shape_cast %44 : vector<1x4x32x8xf32> to vector<4x32x8xf32>
    "tpu.trace_start"() <{level = 10 : i32, message = "hnc,hcd->hnd"}> : () -> ()
    %cst_34 = arith.constant dense<0.000000e+00> : vector<4x8x8xf32>
    %46 = tpu.matmul %29, %45, %cst_34 {dimension_numbers = #tpu.dot_dimension_numbers<[2], [1], [1], [2], [0, 0, 0, 1, 1, 2], [0], [0]>} : vector<4x8x32xf32>, vector<4x32x8xf32>, vector<4x8x8xf32> -> vector<4x8x8xf32>
    "tpu.trace_stop"() : () -> ()
    %c0_35 = arith.constant 0 : index
    %c0_36 = arith.constant 0 : index
    %c0_37 = arith.constant 0 : index
    %c0_38 = arith.constant 0 : index
    %47 = vector.load %arg9[%c0_35, %c0_36, %c0_37, %c0_38] : memref<2x4x1x8xf32, #tpu.memory_space<vmem>>, vector<1x4x1x8xf32>
    %48 = vector.shape_cast %47 : vector<1x4x1x8xf32> to vector<4x1x8xf32>
    %49 = vector.broadcast %48 : vector<4x1x8xf32> to vector<4x8x8xf32>
    %50 = arith.addf %46, %49 : vector<4x8x8xf32>
    "tpu.trace_start"() <{level = 10 : i32, message = "hqd,hkd->hqk"}> : () -> ()
    %cst_39 = arith.constant dense<0.000000e+00> : vector<4x8x8xf32>
    %51 = tpu.matmul %36, %43, %cst_39 {dimension_numbers = #tpu.dot_dimension_numbers<[2], [2], [1], [1], [0, 0, 0, 1, 1, 1], [0], [0]>} : vector<4x8x8xf32>, vector<4x8x8xf32>, vector<4x8x8xf32> -> vector<4x8x8xf32>
    "tpu.trace_stop"() : () -> ()
    %cst_40 = arith.constant 0.353553385 : f32
    %52 = vector.broadcast %cst_40 : f32 to vector<4x8x8xf32>
    %53 = arith.mulf %51, %52 : vector<4x8x8xf32>
    %cst_41 = arith.constant dense<0xFF800000> : vector<4x8xf32>
    %54 = vector.multi_reduction <maximumf>, %53, %cst_41 [2] : vector<4x8x8xf32> to vector<4x8xf32>
    %55 = vector.shape_cast %54 : vector<4x8xf32> to vector<4x8x1xf32>
    %56 = vector.broadcast %55 : vector<4x8x1xf32> to vector<4x8x8xf32>
    %57 = arith.subf %53, %56 : vector<4x8x8xf32>
    %58 = math.exp %57 : vector<4x8x8xf32>
    %cst_42 = arith.constant dense<0.000000e+00> : vector<4x8xf32>
    %59 = vector.multi_reduction <add>, %58, %cst_42 [2] : vector<4x8x8xf32> to vector<4x8xf32>
    %60 = vector.shape_cast %59 : vector<4x8xf32> to vector<4x8x1xf32>
    %61 = tpu.reciprocal %60 {approx = true} : vector<4x8x1xf32> -> vector<4x8x1xf32>
    %62 = vector.broadcast %61 : vector<4x8x1xf32> to vector<4x8x8xf32>
    %63 = arith.mulf %58, %62 : vector<4x8x8xf32>
    "tpu.trace_start"() <{level = 10 : i32, message = "hqk,hkd->hqd"}> : () -> ()
    %cst_43 = arith.constant dense<0.000000e+00> : vector<4x8x8xf32>
    %64 = tpu.matmul %63, %50, %cst_43 {dimension_numbers = #tpu.dot_dimension_numbers<[2], [1], [1], [2], [0, 0, 0, 1, 1, 2], [0], [0]>} : vector<4x8x8xf32>, vector<4x8x8xf32>, vector<4x8x8xf32> -> vector<4x8x8xf32>
    "tpu.trace_stop"() : () -> ()
    %c0_44 = arith.constant 0 : index
    %c0_45 = arith.constant 0 : index
    %c0_46 = arith.constant 0 : index
    %c0_47 = arith.constant 0 : index
    %65 = vector.load %arg10[%c0_44, %c0_45, %c0_46, %c0_47] : memref<2x4x8x32xf32, #tpu.memory_space<vmem>>, vector<1x4x8x32xf32>
    %66 = vector.shape_cast %65 : vector<1x4x8x32xf32> to vector<4x8x32xf32>
    "tpu.trace_start"() <{level = 10 : i32, message = "hqd,hdj->hqj"}> : () -> ()
    %cst_48 = arith.constant dense<0.000000e+00> : vector<4x8x32xf32>
    %67 = tpu.matmul %64, %66, %cst_48 {dimension_numbers = #tpu.dot_dimension_numbers<[2], [1], [1], [2], [0, 0, 0, 1, 1, 2], [0], [0]>} : vector<4x8x8xf32>, vector<4x8x32xf32>, vector<4x8x32xf32> -> vector<4x8x32xf32>
    "tpu.trace_stop"() : () -> ()
    %cst_49 = arith.constant dense<0.000000e+00> : vector<8x32xf32>
    %68 = vector.multi_reduction <add>, %67, %cst_49 [0] : vector<4x8x32xf32> to vector<8x32xf32>
    %69 = arith.addf %1, %68 : vector<8x32xf32>
    %c0_50 = arith.constant 0 : index
    %c0_51 = arith.constant 0 : index
    %c0_52 = arith.constant 0 : index
    %70 = vector.load %arg11[%c0_50, %c0_51, %c0_52] : memref<2x1x32xf32, #tpu.memory_space<vmem>>, vector<1x1x32xf32>
    %71 = vector.shape_cast %70 : vector<1x1x32xf32> to vector<1x32xf32>
    %72 = vector.broadcast %71 : vector<1x32xf32> to vector<8x32xf32>
    %73 = arith.addf %69, %72 : vector<8x32xf32>
    %c0_53 = arith.constant 0 : index
    %c0_54 = arith.constant 0 : index
    %c0_55 = arith.constant 0 : index
    %74 = vector.load %arg12[%c0_53, %c0_54, %c0_55] : memref<2x1x32xf32, #tpu.memory_space<vmem>>, vector<1x1x32xf32>
    %75 = vector.shape_cast %74 : vector<1x1x32xf32> to vector<1x32xf32>
    %c0_56 = arith.constant 0 : index
    %c0_57 = arith.constant 0 : index
    %c0_58 = arith.constant 0 : index
    %76 = vector.load %arg13[%c0_56, %c0_57, %c0_58] : memref<2x1x32xf32, #tpu.memory_space<vmem>>, vector<1x1x32xf32>
    %77 = vector.shape_cast %76 : vector<1x1x32xf32> to vector<1x32xf32>
    %cst_59 = arith.constant dense<0.000000e+00> : vector<8xf32>
    %78 = vector.multi_reduction <add>, %73, %cst_59 [1] : vector<8x32xf32> to vector<8xf32>
    %79 = vector.shape_cast %78 : vector<8xf32> to vector<8x1xf32>
    %cst_60 = arith.constant 3.200000e+01 : f32
    %80 = vector.broadcast %cst_60 : f32 to vector<8x1xf32>
    %81 = arith.divf %79, %80 : vector<8x1xf32>
    %82 = vector.broadcast %81 : vector<8x1xf32> to vector<8x32xf32>
    %83 = arith.subf %73, %82 : vector<8x32xf32>
    %84 = arith.mulf %83, %83 : vector<8x32xf32>
    %cst_61 = arith.constant dense<0.000000e+00> : vector<8xf32>
    %85 = vector.multi_reduction <add>, %84, %cst_61 [1] : vector<8x32xf32> to vector<8xf32>
    %86 = vector.shape_cast %85 : vector<8xf32> to vector<8x1xf32>
    %cst_62 = arith.constant 3.200000e+01 : f32
    %87 = vector.broadcast %cst_62 : f32 to vector<8x1xf32>
    %88 = arith.divf %86, %87 : vector<8x1xf32>
    %89 = vector.broadcast %81 : vector<8x1xf32> to vector<8x32xf32>
    %90 = arith.subf %73, %89 : vector<8x32xf32>
    %cst_63 = arith.constant 9.99999974E-6 : f32
    %91 = vector.broadcast %cst_63 : f32 to vector<8x1xf32>
    %92 = arith.addf %88, %91 : vector<8x1xf32>
    %93 = math.rsqrt %92 : vector<8x1xf32>
    %94 = vector.broadcast %93 : vector<8x1xf32> to vector<8x32xf32>
    %95 = arith.mulf %90, %94 : vector<8x32xf32>
    %96 = vector.broadcast %75 : vector<1x32xf32> to vector<8x32xf32>
    %97 = arith.mulf %95, %96 : vector<8x32xf32>
    %98 = vector.broadcast %77 : vector<1x32xf32> to vector<8x32xf32>
    %99 = arith.addf %97, %98 : vector<8x32xf32>
    %c0_64 = arith.constant 0 : index
    %c0_65 = arith.constant 0 : index
    %c0_66 = arith.constant 0 : index
    %100 = vector.load %arg14[%c0_64, %c0_65, %c0_66] : memref<2x32x128xf32, #tpu.memory_space<vmem>>, vector<1x32x128xf32>
    %101 = vector.shape_cast %100 : vector<1x32x128xf32> to vector<32x128xf32>
    %cst_67 = arith.constant dense<0.000000e+00> : vector<8x128xf32>
    %102 = tpu.matmul %99, %101, %cst_67 {dimension_numbers = #tpu.dot_dimension_numbers<[1], [0], [0], [1], [0, 0, 1, 1], [], []>} : vector<8x32xf32>, vector<32x128xf32>, vector<8x128xf32> -> vector<8x128xf32>
    %c0_68 = arith.constant 0 : index
    %c0_69 = arith.constant 0 : index
    %c0_70 = arith.constant 0 : index
    %103 = vector.load %arg15[%c0_68, %c0_69, %c0_70] : memref<2x1x128xf32, #tpu.memory_space<vmem>>, vector<1x1x128xf32>
    %104 = vector.shape_cast %103 : vector<1x1x128xf32> to vector<1x128xf32>
    %105 = vector.broadcast %104 : vector<1x128xf32> to vector<8x128xf32>
    %106 = arith.addf %102, %105 : vector<8x128xf32>
    %cst_71 = arith.constant 5.000000e-01 : f32
    %107 = vector.broadcast %cst_71 : f32 to vector<8x128xf32>
    %108 = arith.mulf %107, %106 : vector<8x128xf32>
    %cst_72 = arith.constant 0.707106769 : f32
    %109 = vector.broadcast %cst_72 : f32 to vector<8x128xf32>
    %110 = arith.mulf %106, %109 : vector<8x128xf32>
    %111 = math.absf %110 : vector<8x128xf32>
    %cst_73 = arith.constant 0.327591091 : f32
    %112 = vector.broadcast %cst_73 : f32 to vector<8x128xf32>
    %113 = arith.mulf %112, %111 : vector<8x128xf32>
    %cst_74 = arith.constant 1.000000e+00 : f32
    %114 = vector.broadcast %cst_74 : f32 to vector<8x128xf32>
    %115 = arith.addf %114, %113 : vector<8x128xf32>
    %cst_75 = arith.constant 1.000000e+00 : f32
    %116 = vector.broadcast %cst_75 : f32 to vector<8x128xf32>
    %117 = arith.divf %116, %115 : vector<8x128xf32>
    %cst_76 = arith.constant 1.06140542 : f32
    %118 = vector.broadcast %cst_76 : f32 to vector<8x128xf32>
    %119 = arith.mulf %118, %117 : vector<8x128xf32>
    %cst_77 = arith.constant -1.45315206 : f32
    %120 = vector.broadcast %cst_77 : f32 to vector<8x128xf32>
    %121 = arith.addf %119, %120 : vector<8x128xf32>
    %122 = arith.mulf %121, %117 : vector<8x128xf32>
    %cst_78 = arith.constant 1.42141378 : f32
    %123 = vector.broadcast %cst_78 : f32 to vector<8x128xf32>
    %124 = arith.addf %122, %123 : vector<8x128xf32>
    %125 = arith.mulf %124, %117 : vector<8x128xf32>
    %cst_79 = arith.constant -0.284496725 : f32
    %126 = vector.broadcast %cst_79 : f32 to vector<8x128xf32>
    %127 = arith.addf %125, %126 : vector<8x128xf32>
    %128 = arith.mulf %127, %117 : vector<8x128xf32>
    %cst_80 = arith.constant 0.254829586 : f32
    %129 = vector.broadcast %cst_80 : f32 to vector<8x128xf32>
    %130 = arith.addf %128, %129 : vector<8x128xf32>
    %131 = arith.mulf %130, %117 : vector<8x128xf32>
    %cst_81 = arith.constant 0.000000e+00 : f32
    %132 = vector.broadcast %cst_81 : f32 to vector<8x128xf32>
    %133 = arith.subf %132, %111 : vector<8x128xf32>
    %134 = arith.mulf %133, %111 : vector<8x128xf32>
    %135 = math.exp %134 : vector<8x128xf32>
    %136 = arith.mulf %131, %135 : vector<8x128xf32>
    %cst_82 = arith.constant 1.000000e+00 : f32
    %137 = vector.broadcast %cst_82 : f32 to vector<8x128xf32>
    %138 = arith.subf %137, %136 : vector<8x128xf32>
    %cst_83 = arith.constant 0.000000e+00 : f32
    %139 = vector.broadcast %cst_83 : f32 to vector<8x128xf32>
    %140 = arith.cmpf oge, %110, %139 : vector<8x128xf32>
    %cst_84 = arith.constant 0.000000e+00 : f32
    %141 = vector.broadcast %cst_84 : f32 to vector<8x128xf32>
    %142 = arith.subf %141, %138 : vector<8x128xf32>
    %143 = arith.select %140, %138, %142 : vector<8x128xi1>, vector<8x128xf32>
    %cst_85 = arith.constant 1.000000e+00 : f32
    %144 = vector.broadcast %cst_85 : f32 to vector<8x128xf32>
    %145 = arith.addf %144, %143 : vector<8x128xf32>
    %146 = arith.mulf %108, %145 : vector<8x128xf32>
    %c0_86 = arith.constant 0 : index
    %c0_87 = arith.constant 0 : index
    %c0_88 = arith.constant 0 : index
    %147 = vector.load %arg16[%c0_86, %c0_87, %c0_88] : memref<2x128x32xf32, #tpu.memory_space<vmem>>, vector<1x128x32xf32>
    %148 = vector.shape_cast %147 : vector<1x128x32xf32> to vector<128x32xf32>
    %cst_89 = arith.constant dense<0.000000e+00> : vector<8x32xf32>
    %149 = tpu.matmul %146, %148, %cst_89 {dimension_numbers = #tpu.dot_dimension_numbers<[1], [0], [0], [1], [0, 0, 1, 1], [], []>} : vector<8x128xf32>, vector<128x32xf32>, vector<8x32xf32> -> vector<8x32xf32>
    %150 = arith.addf %73, %149 : vector<8x32xf32>
    %c0_90 = arith.constant 0 : index
    %c0_91 = arith.constant 0 : index
    %c0_92 = arith.constant 0 : index
    %151 = vector.load %arg17[%c0_90, %c0_91, %c0_92] : memref<2x1x32xf32, #tpu.memory_space<vmem>>, vector<1x1x32xf32>
    %152 = vector.shape_cast %151 : vector<1x1x32xf32> to vector<1x32xf32>
    %153 = vector.broadcast %152 : vector<1x32xf32> to vector<8x32xf32>
    %154 = arith.addf %150, %153 : vector<8x32xf32>
    %c1 = arith.constant 1 : index
    %c0_93 = arith.constant 0 : index
    %c0_94 = arith.constant 0 : index
    %155 = vector.load %arg2[%c1, %c0_93, %c0_94] : memref<2x1x32xf32, #tpu.memory_space<vmem>>, vector<1x1x32xf32>
    %156 = vector.shape_cast %155 : vector<1x1x32xf32> to vector<1x32xf32>
    %c1_95 = arith.constant 1 : index
    %c0_96 = arith.constant 0 : index
    %c0_97 = arith.constant 0 : index
    %157 = vector.load %arg3[%c1_95, %c0_96, %c0_97] : memref<2x1x32xf32, #tpu.memory_space<vmem>>, vector<1x1x32xf32>
    %158 = vector.shape_cast %157 : vector<1x1x32xf32> to vector<1x32xf32>
    %cst_98 = arith.constant dense<0.000000e+00> : vector<8xf32>
    %159 = vector.multi_reduction <add>, %154, %cst_98 [1] : vector<8x32xf32> to vector<8xf32>
    %160 = vector.shape_cast %159 : vector<8xf32> to vector<8x1xf32>
    %cst_99 = arith.constant 3.200000e+01 : f32
    %161 = vector.broadcast %cst_99 : f32 to vector<8x1xf32>
    %162 = arith.divf %160, %161 : vector<8x1xf32>
    %163 = vector.broadcast %162 : vector<8x1xf32> to vector<8x32xf32>
    %164 = arith.subf %154, %163 : vector<8x32xf32>
    %165 = arith.mulf %164, %164 : vector<8x32xf32>
    %cst_100 = arith.constant dense<0.000000e+00> : vector<8xf32>
    %166 = vector.multi_reduction <add>, %165, %cst_100 [1] : vector<8x32xf32> to vector<8xf32>
    %167 = vector.shape_cast %166 : vector<8xf32> to vector<8x1xf32>
    %cst_101 = arith.constant 3.200000e+01 : f32
    %168 = vector.broadcast %cst_101 : f32 to vector<8x1xf32>
    %169 = arith.divf %167, %168 : vector<8x1xf32>
    %170 = vector.broadcast %162 : vector<8x1xf32> to vector<8x32xf32>
    %171 = arith.subf %154, %170 : vector<8x32xf32>
    %cst_102 = arith.constant 9.99999974E-6 : f32
    %172 = vector.broadcast %cst_102 : f32 to vector<8x1xf32>
    %173 = arith.addf %169, %172 : vector<8x1xf32>
    %174 = math.rsqrt %173 : vector<8x1xf32>
    %175 = vector.broadcast %174 : vector<8x1xf32> to vector<8x32xf32>
    %176 = arith.mulf %171, %175 : vector<8x32xf32>
    %177 = vector.broadcast %156 : vector<1x32xf32> to vector<8x32xf32>
    %178 = arith.mulf %176, %177 : vector<8x32xf32>
    %179 = vector.broadcast %158 : vector<1x32xf32> to vector<8x32xf32>
    %180 = arith.addf %178, %179 : vector<8x32xf32>
    %181 = vector.shape_cast %180 : vector<8x32xf32> to vector<1x8x32xf32>
    %182 = vector.broadcast %181 : vector<1x8x32xf32> to vector<4x8x32xf32>
    %c1_103 = arith.constant 1 : index
    %c0_104 = arith.constant 0 : index
    %c0_105 = arith.constant 0 : index
    %c0_106 = arith.constant 0 : index
    %183 = vector.load %arg4[%c1_103, %c0_104, %c0_105, %c0_106] : memref<2x4x32x8xf32, #tpu.memory_space<vmem>>, vector<1x4x32x8xf32>
    %184 = vector.shape_cast %183 : vector<1x4x32x8xf32> to vector<4x32x8xf32>
    "tpu.trace_start"() <{level = 10 : i32, message = "hnc,hcd->hnd"}> : () -> ()
    %cst_107 = arith.constant dense<0.000000e+00> : vector<4x8x8xf32>
    %185 = tpu.matmul %182, %184, %cst_107 {dimension_numbers = #tpu.dot_dimension_numbers<[2], [1], [1], [2], [0, 0, 0, 1, 1, 2], [0], [0]>} : vector<4x8x32xf32>, vector<4x32x8xf32>, vector<4x8x8xf32> -> vector<4x8x8xf32>
    "tpu.trace_stop"() : () -> ()
    %c1_108 = arith.constant 1 : index
    %c0_109 = arith.constant 0 : index
    %c0_110 = arith.constant 0 : index
    %c0_111 = arith.constant 0 : index
    %186 = vector.load %arg7[%c1_108, %c0_109, %c0_110, %c0_111] : memref<2x4x1x8xf32, #tpu.memory_space<vmem>>, vector<1x4x1x8xf32>
    %187 = vector.shape_cast %186 : vector<1x4x1x8xf32> to vector<4x1x8xf32>
    %188 = vector.broadcast %187 : vector<4x1x8xf32> to vector<4x8x8xf32>
    %189 = arith.addf %185, %188 : vector<4x8x8xf32>
    %c1_112 = arith.constant 1 : index
    %c0_113 = arith.constant 0 : index
    %c0_114 = arith.constant 0 : index
    %c0_115 = arith.constant 0 : index
    %190 = vector.load %arg5[%c1_112, %c0_113, %c0_114, %c0_115] : memref<2x4x32x8xf32, #tpu.memory_space<vmem>>, vector<1x4x32x8xf32>
    %191 = vector.shape_cast %190 : vector<1x4x32x8xf32> to vector<4x32x8xf32>
    "tpu.trace_start"() <{level = 10 : i32, message = "hnc,hcd->hnd"}> : () -> ()
    %cst_116 = arith.constant dense<0.000000e+00> : vector<4x8x8xf32>
    %192 = tpu.matmul %182, %191, %cst_116 {dimension_numbers = #tpu.dot_dimension_numbers<[2], [1], [1], [2], [0, 0, 0, 1, 1, 2], [0], [0]>} : vector<4x8x32xf32>, vector<4x32x8xf32>, vector<4x8x8xf32> -> vector<4x8x8xf32>
    "tpu.trace_stop"() : () -> ()
    %c1_117 = arith.constant 1 : index
    %c0_118 = arith.constant 0 : index
    %c0_119 = arith.constant 0 : index
    %c0_120 = arith.constant 0 : index
    %193 = vector.load %arg8[%c1_117, %c0_118, %c0_119, %c0_120] : memref<2x4x1x8xf32, #tpu.memory_space<vmem>>, vector<1x4x1x8xf32>
    %194 = vector.shape_cast %193 : vector<1x4x1x8xf32> to vector<4x1x8xf32>
    %195 = vector.broadcast %194 : vector<4x1x8xf32> to vector<4x8x8xf32>
    %196 = arith.addf %192, %195 : vector<4x8x8xf32>
    %c1_121 = arith.constant 1 : index
    %c0_122 = arith.constant 0 : index
    %c0_123 = arith.constant 0 : index
    %c0_124 = arith.constant 0 : index
    %197 = vector.load %arg6[%c1_121, %c0_122, %c0_123, %c0_124] : memref<2x4x32x8xf32, #tpu.memory_space<vmem>>, vector<1x4x32x8xf32>
    %198 = vector.shape_cast %197 : vector<1x4x32x8xf32> to vector<4x32x8xf32>
    "tpu.trace_start"() <{level = 10 : i32, message = "hnc,hcd->hnd"}> : () -> ()
    %cst_125 = arith.constant dense<0.000000e+00> : vector<4x8x8xf32>
    %199 = tpu.matmul %182, %198, %cst_125 {dimension_numbers = #tpu.dot_dimension_numbers<[2], [1], [1], [2], [0, 0, 0, 1, 1, 2], [0], [0]>} : vector<4x8x32xf32>, vector<4x32x8xf32>, vector<4x8x8xf32> -> vector<4x8x8xf32>
    "tpu.trace_stop"() : () -> ()
    %c1_126 = arith.constant 1 : index
    %c0_127 = arith.constant 0 : index
    %c0_128 = arith.constant 0 : index
    %c0_129 = arith.constant 0 : index
    %200 = vector.load %arg9[%c1_126, %c0_127, %c0_128, %c0_129] : memref<2x4x1x8xf32, #tpu.memory_space<vmem>>, vector<1x4x1x8xf32>
    %201 = vector.shape_cast %200 : vector<1x4x1x8xf32> to vector<4x1x8xf32>
    %202 = vector.broadcast %201 : vector<4x1x8xf32> to vector<4x8x8xf32>
    %203 = arith.addf %199, %202 : vector<4x8x8xf32>
    "tpu.trace_start"() <{level = 10 : i32, message = "hqd,hkd->hqk"}> : () -> ()
    %cst_130 = arith.constant dense<0.000000e+00> : vector<4x8x8xf32>
    %204 = tpu.matmul %189, %196, %cst_130 {dimension_numbers = #tpu.dot_dimension_numbers<[2], [2], [1], [1], [0, 0, 0, 1, 1, 1], [0], [0]>} : vector<4x8x8xf32>, vector<4x8x8xf32>, vector<4x8x8xf32> -> vector<4x8x8xf32>
    "tpu.trace_stop"() : () -> ()
    %cst_131 = arith.constant 0.353553385 : f32
    %205 = vector.broadcast %cst_131 : f32 to vector<4x8x8xf32>
    %206 = arith.mulf %204, %205 : vector<4x8x8xf32>
    %cst_132 = arith.constant dense<0xFF800000> : vector<4x8xf32>
    %207 = vector.multi_reduction <maximumf>, %206, %cst_132 [2] : vector<4x8x8xf32> to vector<4x8xf32>
    %208 = vector.shape_cast %207 : vector<4x8xf32> to vector<4x8x1xf32>
    %209 = vector.broadcast %208 : vector<4x8x1xf32> to vector<4x8x8xf32>
    %210 = arith.subf %206, %209 : vector<4x8x8xf32>
    %211 = math.exp %210 : vector<4x8x8xf32>
    %cst_133 = arith.constant dense<0.000000e+00> : vector<4x8xf32>
    %212 = vector.multi_reduction <add>, %211, %cst_133 [2] : vector<4x8x8xf32> to vector<4x8xf32>
    %213 = vector.shape_cast %212 : vector<4x8xf32> to vector<4x8x1xf32>
    %214 = tpu.reciprocal %213 {approx = true} : vector<4x8x1xf32> -> vector<4x8x1xf32>
    %215 = vector.broadcast %214 : vector<4x8x1xf32> to vector<4x8x8xf32>
    %216 = arith.mulf %211, %215 : vector<4x8x8xf32>
    "tpu.trace_start"() <{level = 10 : i32, message = "hqk,hkd->hqd"}> : () -> ()
    %cst_134 = arith.constant dense<0.000000e+00> : vector<4x8x8xf32>
    %217 = tpu.matmul %216, %203, %cst_134 {dimension_numbers = #tpu.dot_dimension_numbers<[2], [1], [1], [2], [0, 0, 0, 1, 1, 2], [0], [0]>} : vector<4x8x8xf32>, vector<4x8x8xf32>, vector<4x8x8xf32> -> vector<4x8x8xf32>
    "tpu.trace_stop"() : () -> ()
    %c1_135 = arith.constant 1 : index
    %c0_136 = arith.constant 0 : index
    %c0_137 = arith.constant 0 : index
    %c0_138 = arith.constant 0 : index
    %218 = vector.load %arg10[%c1_135, %c0_136, %c0_137, %c0_138] : memref<2x4x8x32xf32, #tpu.memory_space<vmem>>, vector<1x4x8x32xf32>
    %219 = vector.shape_cast %218 : vector<1x4x8x32xf32> to vector<4x8x32xf32>
    "tpu.trace_start"() <{level = 10 : i32, message = "hqd,hdj->hqj"}> : () -> ()
    %cst_139 = arith.constant dense<0.000000e+00> : vector<4x8x32xf32>
    %220 = tpu.matmul %217, %219, %cst_139 {dimension_numbers = #tpu.dot_dimension_numbers<[2], [1], [1], [2], [0, 0, 0, 1, 1, 2], [0], [0]>} : vector<4x8x8xf32>, vector<4x8x32xf32>, vector<4x8x32xf32> -> vector<4x8x32xf32>
    "tpu.trace_stop"() : () -> ()
    %cst_140 = arith.constant dense<0.000000e+00> : vector<8x32xf32>
    %221 = vector.multi_reduction <add>, %220, %cst_140 [0] : vector<4x8x32xf32> to vector<8x32xf32>
    %222 = arith.addf %154, %221 : vector<8x32xf32>
    %c1_141 = arith.constant 1 : index
    %c0_142 = arith.constant 0 : index
    %c0_143 = arith.constant 0 : index
    %223 = vector.load %arg11[%c1_141, %c0_142, %c0_143] : memref<2x1x32xf32, #tpu.memory_space<vmem>>, vector<1x1x32xf32>
    %224 = vector.shape_cast %223 : vector<1x1x32xf32> to vector<1x32xf32>
    %225 = vector.broadcast %224 : vector<1x32xf32> to vector<8x32xf32>
    %226 = arith.addf %222, %225 : vector<8x32xf32>
    %c1_144 = arith.constant 1 : index
    %c0_145 = arith.constant 0 : index
    %c0_146 = arith.constant 0 : index
    %227 = vector.load %arg12[%c1_144, %c0_145, %c0_146] : memref<2x1x32xf32, #tpu.memory_space<vmem>>, vector<1x1x32xf32>
    %228 = vector.shape_cast %227 : vector<1x1x32xf32> to vector<1x32xf32>
    %c1_147 = arith.constant 1 : index
    %c0_148 = arith.constant 0 : index
    %c0_149 = arith.constant 0 : index
    %229 = vector.load %arg13[%c1_147, %c0_148, %c0_149] : memref<2x1x32xf32, #tpu.memory_space<vmem>>, vector<1x1x32xf32>
    %230 = vector.shape_cast %229 : vector<1x1x32xf32> to vector<1x32xf32>
    %cst_150 = arith.constant dense<0.000000e+00> : vector<8xf32>
    %231 = vector.multi_reduction <add>, %226, %cst_150 [1] : vector<8x32xf32> to vector<8xf32>
    %232 = vector.shape_cast %231 : vector<8xf32> to vector<8x1xf32>
    %cst_151 = arith.constant 3.200000e+01 : f32
    %233 = vector.broadcast %cst_151 : f32 to vector<8x1xf32>
    %234 = arith.divf %232, %233 : vector<8x1xf32>
    %235 = vector.broadcast %234 : vector<8x1xf32> to vector<8x32xf32>
    %236 = arith.subf %226, %235 : vector<8x32xf32>
    %237 = arith.mulf %236, %236 : vector<8x32xf32>
    %cst_152 = arith.constant dense<0.000000e+00> : vector<8xf32>
    %238 = vector.multi_reduction <add>, %237, %cst_152 [1] : vector<8x32xf32> to vector<8xf32>
    %239 = vector.shape_cast %238 : vector<8xf32> to vector<8x1xf32>
    %cst_153 = arith.constant 3.200000e+01 : f32
    %240 = vector.broadcast %cst_153 : f32 to vector<8x1xf32>
    %241 = arith.divf %239, %240 : vector<8x1xf32>
    %242 = vector.broadcast %234 : vector<8x1xf32> to vector<8x32xf32>
    %243 = arith.subf %226, %242 : vector<8x32xf32>
    %cst_154 = arith.constant 9.99999974E-6 : f32
    %244 = vector.broadcast %cst_154 : f32 to vector<8x1xf32>
    %245 = arith.addf %241, %244 : vector<8x1xf32>
    %246 = math.rsqrt %245 : vector<8x1xf32>
    %247 = vector.broadcast %246 : vector<8x1xf32> to vector<8x32xf32>
    %248 = arith.mulf %243, %247 : vector<8x32xf32>
    %249 = vector.broadcast %228 : vector<1x32xf32> to vector<8x32xf32>
    %250 = arith.mulf %248, %249 : vector<8x32xf32>
    %251 = vector.broadcast %230 : vector<1x32xf32> to vector<8x32xf32>
    %252 = arith.addf %250, %251 : vector<8x32xf32>
    %c1_155 = arith.constant 1 : index
    %c0_156 = arith.constant 0 : index
    %c0_157 = arith.constant 0 : index
    %253 = vector.load %arg14[%c1_155, %c0_156, %c0_157] : memref<2x32x128xf32, #tpu.memory_space<vmem>>, vector<1x32x128xf32>
    %254 = vector.shape_cast %253 : vector<1x32x128xf32> to vector<32x128xf32>
    %cst_158 = arith.constant dense<0.000000e+00> : vector<8x128xf32>
    %255 = tpu.matmul %252, %254, %cst_158 {dimension_numbers = #tpu.dot_dimension_numbers<[1], [0], [0], [1], [0, 0, 1, 1], [], []>} : vector<8x32xf32>, vector<32x128xf32>, vector<8x128xf32> -> vector<8x128xf32>
    %c1_159 = arith.constant 1 : index
    %c0_160 = arith.constant 0 : index
    %c0_161 = arith.constant 0 : index
    %256 = vector.load %arg15[%c1_159, %c0_160, %c0_161] : memref<2x1x128xf32, #tpu.memory_space<vmem>>, vector<1x1x128xf32>
    %257 = vector.shape_cast %256 : vector<1x1x128xf32> to vector<1x128xf32>
    %258 = vector.broadcast %257 : vector<1x128xf32> to vector<8x128xf32>
    %259 = arith.addf %255, %258 : vector<8x128xf32>
    %cst_162 = arith.constant 5.000000e-01 : f32
    %260 = vector.broadcast %cst_162 : f32 to vector<8x128xf32>
    %261 = arith.mulf %260, %259 : vector<8x128xf32>
    %cst_163 = arith.constant 0.707106769 : f32
    %262 = vector.broadcast %cst_163 : f32 to vector<8x128xf32>
    %263 = arith.mulf %259, %262 : vector<8x128xf32>
    %264 = math.absf %263 : vector<8x128xf32>
    %cst_164 = arith.constant 0.327591091 : f32
    %265 = vector.broadcast %cst_164 : f32 to vector<8x128xf32>
    %266 = arith.mulf %265, %264 : vector<8x128xf32>
    %cst_165 = arith.constant 1.000000e+00 : f32
    %267 = vector.broadcast %cst_165 : f32 to vector<8x128xf32>
    %268 = arith.addf %267, %266 : vector<8x128xf32>
    %cst_166 = arith.constant 1.000000e+00 : f32
    %269 = vector.broadcast %cst_166 : f32 to vector<8x128xf32>
    %270 = arith.divf %269, %268 : vector<8x128xf32>
    %cst_167 = arith.constant 1.06140542 : f32
    %271 = vector.broadcast %cst_167 : f32 to vector<8x128xf32>
    %272 = arith.mulf %271, %270 : vector<8x128xf32>
    %cst_168 = arith.constant -1.45315206 : f32
    %273 = vector.broadcast %cst_168 : f32 to vector<8x128xf32>
    %274 = arith.addf %272, %273 : vector<8x128xf32>
    %275 = arith.mulf %274, %270 : vector<8x128xf32>
    %cst_169 = arith.constant 1.42141378 : f32
    %276 = vector.broadcast %cst_169 : f32 to vector<8x128xf32>
    %277 = arith.addf %275, %276 : vector<8x128xf32>
    %278 = arith.mulf %277, %270 : vector<8x128xf32>
    %cst_170 = arith.constant -0.284496725 : f32
    %279 = vector.broadcast %cst_170 : f32 to vector<8x128xf32>
    %280 = arith.addf %278, %279 : vector<8x128xf32>
    %281 = arith.mulf %280, %270 : vector<8x128xf32>
    %cst_171 = arith.constant 0.254829586 : f32
    %282 = vector.broadcast %cst_171 : f32 to vector<8x128xf32>
    %283 = arith.addf %281, %282 : vector<8x128xf32>
    %284 = arith.mulf %283, %270 : vector<8x128xf32>
    %cst_172 = arith.constant 0.000000e+00 : f32
    %285 = vector.broadcast %cst_172 : f32 to vector<8x128xf32>
    %286 = arith.subf %285, %264 : vector<8x128xf32>
    %287 = arith.mulf %286, %264 : vector<8x128xf32>
    %288 = math.exp %287 : vector<8x128xf32>
    %289 = arith.mulf %284, %288 : vector<8x128xf32>
    %cst_173 = arith.constant 1.000000e+00 : f32
    %290 = vector.broadcast %cst_173 : f32 to vector<8x128xf32>
    %291 = arith.subf %290, %289 : vector<8x128xf32>
    %cst_174 = arith.constant 0.000000e+00 : f32
    %292 = vector.broadcast %cst_174 : f32 to vector<8x128xf32>
    %293 = arith.cmpf oge, %263, %292 : vector<8x128xf32>
    %cst_175 = arith.constant 0.000000e+00 : f32
    %294 = vector.broadcast %cst_175 : f32 to vector<8x128xf32>
    %295 = arith.subf %294, %291 : vector<8x128xf32>
    %296 = arith.select %293, %291, %295 : vector<8x128xi1>, vector<8x128xf32>
    %cst_176 = arith.constant 1.000000e+00 : f32
    %297 = vector.broadcast %cst_176 : f32 to vector<8x128xf32>
    %298 = arith.addf %297, %296 : vector<8x128xf32>
    %299 = arith.mulf %261, %298 : vector<8x128xf32>
    %c1_177 = arith.constant 1 : index
    %c0_178 = arith.constant 0 : index
    %c0_179 = arith.constant 0 : index
    %300 = vector.load %arg16[%c1_177, %c0_178, %c0_179] : memref<2x128x32xf32, #tpu.memory_space<vmem>>, vector<1x128x32xf32>
    %301 = vector.shape_cast %300 : vector<1x128x32xf32> to vector<128x32xf32>
    %cst_180 = arith.constant dense<0.000000e+00> : vector<8x32xf32>
    %302 = tpu.matmul %299, %301, %cst_180 {dimension_numbers = #tpu.dot_dimension_numbers<[1], [0], [0], [1], [0, 0, 1, 1], [], []>} : vector<8x128xf32>, vector<128x32xf32>, vector<8x32xf32> -> vector<8x32xf32>
    %303 = arith.addf %226, %302 : vector<8x32xf32>
    %c1_181 = arith.constant 1 : index
    %c0_182 = arith.constant 0 : index
    %c0_183 = arith.constant 0 : index
    %304 = vector.load %arg17[%c1_181, %c0_182, %c0_183] : memref<2x1x32xf32, #tpu.memory_space<vmem>>, vector<1x1x32xf32>
    %305 = vector.shape_cast %304 : vector<1x1x32xf32> to vector<1x32xf32>
    %306 = vector.broadcast %305 : vector<1x32xf32> to vector<8x32xf32>
    %307 = arith.addf %303, %306 : vector<8x32xf32>
    %c0_184 = arith.constant 0 : index
    %c0_185 = arith.constant 0 : index
    %308 = vector.load %arg18[%c0_184, %c0_185] : memref<1x32xf32, #tpu.memory_space<vmem>>, vector<1x32xf32>
    %c0_186 = arith.constant 0 : index
    %c0_187 = arith.constant 0 : index
    %309 = vector.load %arg19[%c0_186, %c0_187] : memref<1x32xf32, #tpu.memory_space<vmem>>, vector<1x32xf32>
    %cst_188 = arith.constant dense<0.000000e+00> : vector<8xf32>
    %310 = vector.multi_reduction <add>, %307, %cst_188 [1] : vector<8x32xf32> to vector<8xf32>
    %311 = vector.shape_cast %310 : vector<8xf32> to vector<8x1xf32>
    %cst_189 = arith.constant 3.200000e+01 : f32
    %312 = vector.broadcast %cst_189 : f32 to vector<8x1xf32>
    %313 = arith.divf %311, %312 : vector<8x1xf32>
    %314 = vector.broadcast %313 : vector<8x1xf32> to vector<8x32xf32>
    %315 = arith.subf %307, %314 : vector<8x32xf32>
    %316 = arith.mulf %315, %315 : vector<8x32xf32>
    %cst_190 = arith.constant dense<0.000000e+00> : vector<8xf32>
    %317 = vector.multi_reduction <add>, %316, %cst_190 [1] : vector<8x32xf32> to vector<8xf32>
    %318 = vector.shape_cast %317 : vector<8xf32> to vector<8x1xf32>
    %cst_191 = arith.constant 3.200000e+01 : f32
    %319 = vector.broadcast %cst_191 : f32 to vector<8x1xf32>
    %320 = arith.divf %318, %319 : vector<8x1xf32>
    %321 = vector.broadcast %313 : vector<8x1xf32> to vector<8x32xf32>
    %322 = arith.subf %307, %321 : vector<8x32xf32>
    %cst_192 = arith.constant 9.99999974E-6 : f32
    %323 = vector.broadcast %cst_192 : f32 to vector<8x1xf32>
    %324 = arith.addf %320, %323 : vector<8x1xf32>
    %325 = math.rsqrt %324 : vector<8x1xf32>
    %326 = vector.broadcast %325 : vector<8x1xf32> to vector<8x32xf32>
    %327 = arith.mulf %322, %326 : vector<8x32xf32>
    %328 = vector.broadcast %308 : vector<1x32xf32> to vector<8x32xf32>
    %329 = arith.mulf %327, %328 : vector<8x32xf32>
    %330 = vector.broadcast %309 : vector<1x32xf32> to vector<8x32xf32>
    %331 = arith.addf %329, %330 : vector<8x32xf32>
    %c0_193 = arith.constant 0 : index
    %c0_194 = arith.constant 0 : index
    %c0_195 = arith.constant 0 : index
    %332 = vector.load %arg20[%c0_193, %c0_194, %c0_195] : memref<1x8x32xf32, #tpu.memory_space<vmem>>, vector<1x8x32xf32>
    %333 = vector.shape_cast %332 : vector<1x8x32xf32> to vector<8x32xf32>
    %334 = vector.shape_cast %331 : vector<8x32xf32> to vector<1x8x32xf32>
    tpu.vector_store %arg20[%c0_193, %c0_194, %c0_195], %334 {strides = array<i32>} : memref<1x8x32xf32, #tpu.memory_space<vmem>>, vector<1x8x32xf32>,
    return
  }
  func.func @transform_0(%arg0: i32) -> (i32, i32, i32) {
    %c0_i32 = arith.constant 0 : i32
    %c0_i32_0 = arith.constant 0 : i32
    %c0_i32_1 = arith.constant 0 : i32
    return %arg0, %c0_i32, %c0_i32_0 : i32, i32, i32
  }
  func.func @transform_1(%arg0: i32) -> (i32, i32, i32) {
    %c0_i32 = arith.constant 0 : i32
    %c0_i32_0 = arith.constant 0 : i32
    %c0_i32_1 = arith.constant 0 : i32
    %c0_i32_2 = arith.constant 0 : i32
    return %c0_i32, %c0_i32_0, %c0_i32_1 : i32, i32, i32
  }
  func.func @transform_2(%arg0: i32) -> (i32, i32, i32) {
    %c0_i32 = arith.constant 0 : i32
    %c0_i32_0 = arith.constant 0 : i32
    %c0_i32_1 = arith.constant 0 : i32
    %c0_i32_2 = arith.constant 0 : i32
    return %c0_i32, %c0_i32_0, %c0_i32_1 : i32, i32, i32
  }
  func.func @transform_3(%arg0: i32) -> (i32, i32, i32, i32) {
    %c0_i32 = arith.constant 0 : i32
    %c0_i32_0 = arith.constant 0 : i32
    %c0_i32_1 = arith.constant 0 : i32
    %c0_i32_2 = arith.constant 0 : i32
    %c0_i32_3 = arith.constant 0 : i32
    return %c0_i32, %c0_i32_0, %c0_i32_1, %c0_i32_2 : i32, i32, i32, i32
  }
  func.func @transform_4(%arg0: i32) -> (i32, i32, i32, i32) {
    %c0_i32 = arith.constant 0 : i32
    %c0_i32_0 = arith.constant 0 : i32
    %c0_i32_1 = arith.constant 0 : i32
    %c0_i32_2 = arith.constant 0 : i32
    %c0_i32_3 = arith.constant 0 : i32
    return %c0_i32, %c0_i32_0, %c0_i32_1, %c0_i32_2 : i32, i32, i32, i32
  }
  func.func @transform_5(%arg0: i32) -> (i32, i32, i32, i32) {
    %c0_i32 = arith.constant 0 : i32
    %c0_i32_0 = arith.constant 0 : i32
    %c0_i32_1 = arith.constant 0 : i32
    %c0_i32_2 = arith.constant 0 : i32
    %c0_i32_3 = arith.constant 0 : i32
    return %c0_i32, %c0_i32_0, %c0_i32_1, %c0_i32_2 : i32, i32, i32, i32
  }
  func.func @transform_6(%arg0: i32) -> (i32, i32, i32, i32) {
    %c0_i32 = arith.constant 0 : i32
    %c0_i32_0 = arith.constant 0 : i32
    %c0_i32_1 = arith.constant 0 : i32
    %c0_i32_2 = arith.constant 0 : i32
    %c0_i32_3 = arith.constant 0 : i32
    return %c0_i32, %c0_i32_0, %c0_i32_1, %c0_i32_2 : i32, i32, i32, i32
  }
  func.func @transform_7(%arg0: i32) -> (i32, i32, i32, i32) {
    %c0_i32 = arith.constant 0 : i32
    %c0_i32_0 = arith.constant 0 : i32
    %c0_i32_1 = arith.constant 0 : i32
    %c0_i32_2 = arith.constant 0 : i32
    %c0_i32_3 = arith.constant 0 : i32
    return %c0_i32, %c0_i32_0, %c0_i32_1, %c0_i32_2 : i32, i32, i32, i32
  }
  func.func @transform_8(%arg0: i32) -> (i32, i32, i32, i32) {
    %c0_i32 = arith.constant 0 : i32
    %c0_i32_0 = arith.constant 0 : i32
    %c0_i32_1 = arith.constant 0 : i32
    %c0_i32_2 = arith.constant 0 : i32
    %c0_i32_3 = arith.constant 0 : i32
    return %c0_i32, %c0_i32_0, %c0_i32_1, %c0_i32_2 : i32, i32, i32, i32
  }
  func.func @transform_9(%arg0: i32) -> (i32, i32, i32, i32) {
    %c0_i32 = arith.constant 0 : i32
    %c0_i32_0 = arith.constant 0 : i32
    %c0_i32_1 = arith.constant 0 : i32
    %c0_i32_2 = arith.constant 0 : i32
    %c0_i32_3 = arith.constant 0 : i32
    return %c0_i32, %c0_i32_0, %c0_i32_1, %c0_i32_2 : i32, i32, i32, i32
  }
  func.func @transform_10(%arg0: i32) -> (i32, i32, i32) {
    %c0_i32 = arith.constant 0 : i32
    %c0_i32_0 = arith.constant 0 : i32
    %c0_i32_1 = arith.constant 0 : i32
    %c0_i32_2 = arith.constant 0 : i32
    return %c0_i32, %c0_i32_0, %c0_i32_1 : i32, i32, i32
  }
  func.func @transform_11(%arg0: i32) -> (i32, i32, i32) {
    %c0_i32 = arith.constant 0 : i32
    %c0_i32_0 = arith.constant 0 : i32
    %c0_i32_1 = arith.constant 0 : i32
    %c0_i32_2 = arith.constant 0 : i32
    return %c0_i32, %c0_i32_0, %c0_i32_1 : i32, i32, i32
  }
  func.func @transform_12(%arg0: i32) -> (i32, i32, i32) {
    %c0_i32 = arith.constant 0 : i32
    %c0_i32_0 = arith.constant 0 : i32
    %c0_i32_1 = arith.constant 0 : i32
    %c0_i32_2 = arith.constant 0 : i32
    return %c0_i32, %c0_i32_0, %c0_i32_1 : i32, i32, i32
  }
  func.func @transform_13(%arg0: i32) -> (i32, i32, i32) {
    %c0_i32 = arith.constant 0 : i32
    %c0_i32_0 = arith.constant 0 : i32
    %c0_i32_1 = arith.constant 0 : i32
    %c0_i32_2 = arith.constant 0 : i32
    return %c0_i32, %c0_i32_0, %c0_i32_1 : i32, i32, i32
  }
  func.func @transform_14(%arg0: i32) -> (i32, i32, i32) {
    %c0_i32 = arith.constant 0 : i32
    %c0_i32_0 = arith.constant 0 : i32
    %c0_i32_1 = arith.constant 0 : i32
    %c0_i32_2 = arith.constant 0 : i32
    return %c0_i32, %c0_i32_0, %c0_i32_1 : i32, i32, i32
  }
  func.func @transform_15(%arg0: i32) -> (i32, i32, i32) {
    %c0_i32 = arith.constant 0 : i32
    %c0_i32_0 = arith.constant 0 : i32
    %c0_i32_1 = arith.constant 0 : i32
    %c0_i32_2 = arith.constant 0 : i32
    return %c0_i32, %c0_i32_0, %c0_i32_1 : i32, i32, i32
  }
  func.func @transform_16(%arg0: i32) -> (i32, i32, i32) {
    %c0_i32 = arith.constant 0 : i32
    %c0_i32_0 = arith.constant 0 : i32
    %c0_i32_1 = arith.constant 0 : i32
    %c0_i32_2 = arith.constant 0 : i32
    return %c0_i32, %c0_i32_0, %c0_i32_1 : i32, i32, i32
  }
  func.func @transform_17(%arg0: i32) -> (i32, i32) {
    %c0_i32 = arith.constant 0 : i32
    %c0_i32_0 = arith.constant 0 : i32
    %c0_i32_1 = arith.constant 0 : i32
    return %c0_i32, %c0_i32_0 : i32, i32
  }
  func.func @transform_18(%arg0: i32) -> (i32, i32) {
    %c0_i32 = arith.constant 0 : i32
    %c0_i32_0 = arith.constant 0 : i32
    %c0_i32_1 = arith.constant 0 : i32
    return %c0_i32, %c0_i32_0 : i32, i32
  }
  func.func @transform_19(%arg0: i32) -> (i32, i32, i32) {
    %c0_i32 = arith.constant 0 : i32
    %c0_i32_0 = arith.constant 0 : i32
    %c0_i32_1 = arith.constant 0 : i32
    return %arg0, %c0_i32, %c0_i32_0 : i32, i32, i32
  }
}

</mosaic_0001>

<bundles_post_ra>
// kernel: transformer_forward.1
= control target key start
LH: loop header
LB: loop body
LE: loop exit
PB: predicated region body
PF: predicated region fallthrough
CT: control target
= control target key end

     0   :  { %s7460_s0 = inlined_call_operand.vmem [shape: f32[2,8,32], index: 0, kind: input, shape index: {}]   ;;  %s7461_s1 = inlined_call_operand.vmem [shape: f32[2,1,32], index: 1, kind: input, shape index: {}]   ;;  %s7462_s2 = inlined_call_operand.vmem [shape: f32[2,1,32], index: 2, kind: input, shape index: {}]   ;;  %s7463_s3 = inlined_call_operand.vmem [shape: f32[2,4,32,8], index: 3, kind: input, shape index: {}]   ;;  %s7464_s4 = inlined_call_operand.vmem [shape: f32[2,4,32,8], index: 4, kind: input, shape index: {}]   ;;  %s7465_s5 = inlined_call_operand.vmem [shape: f32[2,4,32,8], index: 5, kind: input, shape index: {}]   ;;  %s7466_s6 = inlined_call_operand.vmem [shape: f32[2,4,1,8], index: 6, kind: input, shape index: {}]   ;;  %s7467_s7 = inlined_call_operand.vmem [shape: f32[2,4,1,8], index: 7, kind: input, shape index: {}]   ;;  %s7468_s8 = inlined_call_operand.vmem [shape: f32[2,4,1,8], index: 8, kind: input, shape index: {}]   ;;  %s7469_s9 = inlined_call_operand.vmem [shape: f32[2,4,8,32], index: 9, kind: input, shape index: {}]   ;;  %s7470_s10 = inlined_call_operand.vmem [shape: f32[2,1,32], index: 10, kind: input, shape index: {}]   ;;  %s7471_s11 = inlined_call_operand.vmem [shape: f32[2,1,32], index: 11, kind: input, shape index: {}]   ;;  %s7472_s12 = inlined_call_operand.vmem [shape: f32[2,1,32], index: 12, kind: input, shape index: {}]   ;;  %s7473_s13 = inlined_call_operand.vmem [shape: f32[2,32,128], index: 13, kind: input, shape index: {}]   ;;  %s7474_s14 = inlined_call_operand.vmem [shape: f32[2,1,128], index: 14, kind: input, shape index: {}]   ;;  %s7475_s15 = inlined_call_operand.vmem [shape: f32[2,128,32], index: 15, kind: input, shape index: {}]   ;;  %s7476_s16 = inlined_call_operand.vmem [shape: f32[2,1,32], index: 16, kind: input, shape index: {}]   ;;  %s7477_s17 = inlined_call_operand.vmem [shape: f32[1,32], index: 17, kind: input, shape index: {}]   ;;  %s7478_s18 = inlined_call_operand.vmem [shape: f32[1,32], index: 18, kind: input, shape index: {}]   ;;  %s7479_s19 = inlined_call_operand.hbm [shape: f32[2,8,32], index: 19, kind: output, shape index: {}]  }
   0x1   :  { %7491 = sst [smem:[#allocation11_spill]] %s7460_s0 }
   0x2   :  { %7492 = sst [smem:[#allocation12_spill]] %s7461_s1 }
   0x3   :  { %7493 = sst [smem:[#allocation13_spill]] %s7462_s2 }
   0x4   :  { %7494 = sst [smem:[#allocation14_spill]] %s7463_s3 }
   0x5   :  { %7495 = sst [smem:[#allocation15_spill]] %s7464_s4 }
   0x6   :  { %7496 = sst [smem:[#allocation16_spill]] %s7465_s5 }
   0x7   :  { %7497 = sst [smem:[#allocation17_spill]] %s7478_s18 }
   0x8   :  { %7498 = sst [smem:[#allocation18_spill]] %s7479_s19 }
   0x9   :  { %24 = vsyncpa [#allocation3], 0 }
   0xa   :  { %26 = vsyncpa [#allocation3 + $0x1], 0  ;;  %s6462_s0 = smov 0   ;;  %s6464_s30 = smov 0  }
   0xb   :  { %s6466_s20 = smov 0   ;;  %s6468_s21 = smov 0  }
   0xc LB: > { %7499 = sst [smem:[#allocation5_spill]] %s6344_s0  ;;  %s6483_s1 = sadd.s32 4294967295, %s6356_s21   ;;  %s6356_s21 = sphi %s6468_s21, %s7520_s21   ;;  %s6352_s20 = sphi %s6466_s20, %s7522_s20   ;;  %s6348_s30 = sphi %s6464_s30, %s7524_s30   ;;  %s6344_s0 = sphi %s6462_s0, %s7523_s0  }
   0xd   : > { %7500 = sst [smem:[#allocation6_spill]] %s6352_s20  ;;  %s5111_s22 = sadd.s32 4294967294, %s6356_s21  }
   0xe   : > { %7501 = sst [smem:[#allocation7_spill]] %s6356_s21  ;;  %s6487_s2 = sadd.s32 1, %s6356_s21  }
   0xf   : > { %7502 = sst [smem:[#allocation8_spill]] %s6487_s2  ;;  %s443_s23 = sadd.s32 1, %s6352_s20 }
  0x10   : > { %s440_s24 = ssub.s32 %s6356_s21, %s6487_s2  ;;  %p453_p0 = scmp.ne.s32.totalorder %s6352_s20, %s6348_s30 }
  0x11   : > { %p441_p1 = scmp.eq.s32.totalorder %s440_s24, 0  ;;  %p454_p2 = scmp.eq.s32.totalorder %s6483_s1, 1 }
  0x12   : > { %p459_p3 = scmp.ne.s32.totalorder %s6348_s30, %s6344_s0  ;;  %p460_p4 = scmp.eq.s32.totalorder %s5111_s22, 1 }
  0x13   : > { %s6498_s25 = scalar_select %p441_p1, %s6352_s20, %s443_s23  }
  0x14   : > { %p6500_p5 = por %p454_p2, %p453_p0  ;;  %p6504_p6 = por %p460_p4, %p459_p3 }
  0x15   : > { %7503 = sst [smem:[#allocation9_spill]] %s6498_s25  ;;  %p5114_p7 = scmp.ge.s32.totalorder %s6356_s21, 1 }
  0x16   : > { %s7505_s26 = scalar_select %p6504_p6, 1, 0 }
  0x17   : > { %p539_p8 = scmp.lt.s32.totalorder %s6356_s21, 3 }
  0x18   : > { %7506 = sst [smem:[#allocation10_spill]] %s7505_s26 }
  0x19   : > { %p540_p9 = pnand %p5114_p7, %p539_p8 }
  0x1a   : > { %p594_p10 = scmp.lt.s32.totalorder (!%p540_p9), %s6483_s1, 1  ;;  %vm601_vm0 = vcmask (!%p540_p9), 261120   ;;  %s7507_s23 = sld [smem:[#allocation11_spill]] (!%p540_p9)  ;;  %v6358_v12 = vmov (!%p540_p9), 0.0|0.0   ;;  %vm6359_vm1 = vmmov (!%p540_p9), 0   ;;  %v6360_v20 = vmov (!%p540_p9), 0.0  }
  0x1b   : > { %543 = sbr.rel (%p540_p9) target bundleno = 5001 (0x1389), region = 96  ;;  %s7508_s20 = sld [smem:[#allocation14_spill]] (!%p540_p9)  ;;  %5998 = vmatprep.subr.bf16.mxu0 (!%p540_p9), %v6358_v12  ;;  %6016 = vmatprep.subr.bf16.mxu1 (!%p540_p9), %v6358_v12  ;;  %vm1605_vm2 = vcmask (!%p540_p9), 64512  }
  0x1c   : > { %5530 = vmatprep.mubr.msk.f32.mxu0 (!%p540_p9), %vm6359_vm1, %v6360_v20  ;;  %5563 = vmatprep.mubr.msk.f32.mxu1 (!%p540_p9), %vm6359_vm1, %v6360_v20  ;;  %s7510_s25 = sld [smem:[#allocation12_spill]] (!%p540_p9)  ;;  %s7511_s4 = sld [smem:[#allocation15_spill]] (!%p540_p9) }
  0x1d   : > { %s7514_s5 = sld [smem:[#allocation16_spill]] (!%p540_p9)  ;;  %s591_s21 = sand.u32 (!%p540_p9), 1, %s6348_s30  }
  0x1e   : > { %s5115_s19 = sshll.u32 (!%p540_p9), %s591_s21, 3  ;;  %s7515_s29 = sld [smem:[#allocation17_spill]] (!%p540_p9) }
  0x1f   : > { %s5307_s26 = sshll.u32 (!%p540_p9), %s6483_s1, 7 }
  0x21   : > { %s7509_s2 = smov (!%p540_p9), %s7508_s20  ;;  %v630_v7 = vld [vmem:[%s7508_s20] sm:$0xff] (!%p540_p9)  ;;  %s7512_s20 = sld [smem:[#allocation13_spill]] (!%p540_p9) }
  0x22   : > { %s595_s27 = scalar_select %p594_p10, %s6483_s1, 1  ;;  %v631_v8 = vld [vmem:[%s7509_s2 + $0x8] sm:$0xff]  ;;  %v642_v9 = vld [vmem:[%s7509_s2 + $0x60] sm:$0xff]  ;;  %v632_v14 = vld [vmem:[%s7509_s2 + $0x10] sm:$0xff] }
  0x23   : > { %v5999_v10 = vpack.c.bf16 %v631_v8, %v630_v7  ;;  %v643_v11 = vld [vmem:[%s7509_s2 + $0x68] sm:$0xff]  ;;  %v633_v15 = vld [vmem:[%s7509_s2 + $0x18] sm:$0xff]  ;;  %v644_v16 = vld [vmem:[%s7509_s2 + $0x70] sm:$0xff]  ;;  %s6361_s1 = smov [#allocation2]  }
  0x24   : > { %s5116_s28 = sshll.u32 %s595_s27, 3  ;;  %v6017_v13 = vpack.c.bf16 %v643_v11, %v642_v9  ;;  %v6002_v17 = vpack.c.bf16 %v633_v15, %v632_v14  ;;  %v645_v18 = vld [vmem:[%s7509_s2 + $0x78] sm:$0xff]  ;;  %v5117_v25 = vld [vmem:[%s7510_s25] ss:$0 sm:$0xff]  ;;  %v635_v28 = vld [vmem:[%s7509_s2 + $0x28] sm:$0xff] }
  0x25   : > { %s597_s24 = scalar_lea.vmem %s7507_s23, %s5116_s28  ;;  %6000 = vmatpush3.bf16.msra.mxu0 %v5999_v10  ;;  %v6020_v19 = vpack.c.bf16 %v645_v18, %v644_v16  ;;  %v634_v26 = vld [vmem:[%s7509_s2 + $0x20] sm:$0xff]  ;;  %v962_v30 = vld [vmem:[%s7511_s4 + $0x28] sm:$0xff]  ;;  %v636_v35 = vld [vmem:[%s7509_s2 + $0x30] sm:$0xff]  ;;  %s593_s28 = scalar_lea.vmem [#allocation2], %s5115_s19 }
  0x26   : > { %v6515_v0 = vld [vmem:[%s597_s24] sm:$0xff]  ;;  %6018 = vmatpush3.bf16.msra.mxu1 %v6017_v13  ;;  %6001 = vmatprep.subr.bf16.mxu0 %v6358_v12  ;;  %v6005_v33 = vpack.c.bf16 %v635_v28, %v634_v26  ;;  %v637_v37 = vld [vmem:[%s7509_s2 + $0x38] sm:$0xff]  ;;  %v963_v38 = vld [vmem:[%s7511_s4 + $0x30] sm:$0xff]  ;;  %s5052_s22 = sshll.u32 %s593_s28, 4  ;;  %s5039_s23 = scalar_lea.sflag [#allocation3], %s591_s21  ;;  %s7419_s22 = int_to_ptr.vmem [resolvable:$true] %s5052_s22 }
  0x27   : > { %v602_v1 = vsel %vm601_vm0, %v6515_v0, 0.0  ;;  %6019 = vmatprep.subr.bf16.mxu1 %v6358_v12  ;;  %v961_v29 = vld [vmem:[%s7511_s4 + $0x20] sm:$0xff]  ;;  %s7513_s18 = smov %s7512_s20  ;;  %v964_v39 = vld [vmem:[%s7511_s4 + $0x38] sm:$0xff]  ;;  %v6008_v40 = vpack.c.bf16 %v637_v37, %v636_v35  ;;  %v639_v43 = vld [vmem:[%s7509_s2 + $0x48] sm:$0xff]  ;;  %s6294_s24 = scalar_lea.vmem %s7419_s22, 128 }
  0x28   : > { %603 = vadd.xlane.f32.xlu0 %v602_v1  ;;  %v5118_v31 = vld [vmem:[%s7512_s20] ss:$0 sm:$0xff]  ;;  %v6029_v34 = vpack.c.bf16 %v962_v30, %v961_v29  ;;  %v6032_v41 = vpack.c.bf16 %v964_v39, %v963_v38  ;;  %v970_v45 = vld [vmem:[%s7511_s4 + $0x68] sm:$0xff]  ;;  %v640_v48 = vld [vmem:[%s7509_s2 + $0x50] sm:$0xff]  ;;  %p6295_p11 = scmp.ne.s32.totalorder %s7419_s22, %s6294_s24  ;;  %s6298_s19 = sshll.u32 %s6361_s1, 4  ;;  %s6299_s19 = int_to_ptr.vmem [resolvable:$false] %s6298_s19 }
  0x29   : > { %6003 = vmatpush3.bf16.msra.mxu0 %v6002_v17  ;;  %v638_v42 = vld [vmem:[%s7509_s2 + $0x40] sm:$0xff]  ;;  %v641_v49 = vld [vmem:[%s7509_s2 + $0x58] sm:$0xff]  ;;  %v971_v50 = vld [vmem:[%s7511_s4 + $0x70] sm:$0xff]  ;;  %s6300_s20 = scalar_lea.vmem %s6299_s19, 256  ;;  %p6301_p0 = scmp.lt.s32.totalorder %s7419_s22, %s6299_s19 }
  0x2a   : > { %6021 = vmatpush3.bf16.msra.mxu1 %v6020_v19  ;;  %6004 = vmatprep.subr.bf16.mxu0 %v6358_v12  ;;  %v969_v44 = vld [vmem:[%s7511_s4 + $0x60] sm:$0xff]  ;;  %v6011_v46 = vpack.c.bf16 %v639_v43, %v638_v42  ;;  %v972_v51 = vld [vmem:[%s7511_s4 + $0x78] sm:$0xff]  ;;  %v6014_v52 = vpack.c.bf16 %v641_v49, %v640_v48  ;;  %v958_v55 = vld [vmem:[%s7511_s4 + $0x8] sm:$0xff]  ;;  %p6296_p12 = pnand %p6295_p11, %p6500_p5  ;;  %p6302_p1 = scmp.lt.s32.totalorder %s6300_s20, %s6294_s24 }
  0x2b   : > { %6028 = vmatprep.subr.bf16.mxu1 %v6358_v12  ;;  %v6041_v47 = vpack.c.bf16 %v970_v45, %v969_v44  ;;  %v6044_v53 = vpack.c.bf16 %v972_v51, %v971_v50  ;;  %v957_v54 = vld [vmem:[%s7511_s4] sm:$0xff]  ;;  %v1286_v57 = vld [vmem:[%s7514_s5 + $0x28] sm:$0xff]  ;;  %v959_v60 = vld [vmem:[%s7511_s4 + $0x10] sm:$0xff] }
  0x2c   : > { %v1285_v56 = vld [vmem:[%s7514_s5 + $0x20] sm:$0xff]  ;;  %v6023_v58 = vpack.c.bf16 %v958_v55, %v957_v54  ;;  %v960_v61 = vld [vmem:[%s7511_s4 + $0x18] sm:$0xff]  ;;  %v1287_v62 = vld [vmem:[%s7514_s5 + $0x30] sm:$0xff]  ;;  %p6297_p13 = pneg %p6296_p12  ;;  %p6303_p2 = por %p6302_p1, %p6301_p0 }
  0x2d   : > { %v6053_v59 = vpack.c.bf16 %v1286_v57, %v1285_v56  ;;  %v1288_v63 = vld [vmem:[%s7514_s5 + $0x38] sm:$0xff]  ;;  %v6026_v1 = vpack.c.bf16 %v960_v61, %v959_v60  ;;  %v967_v9 = vld [vmem:[%s7511_s4 + $0x50] sm:$0xff]  ;;  %v1281_v16 = vld [vmem:[%s7514_s5] sm:$0xff] }
  0x2e   : > { %v968_v10 = vld [vmem:[%s7511_s4 + $0x58] sm:$0xff]  ;;  %v1295_v11 = vld [vmem:[%s7514_s5 + $0x70] sm:$0xff]  ;;  %v1282_v17 = vld [vmem:[%s7514_s5 + $0x8] sm:$0xff]  ;;  %p6304_p3 = pnand %p6303_p2, %p6297_p13 }
  0x2f   : > { %v1296_v13 = vld [vmem:[%s7514_s5 + $0x78] sm:$0xff]  ;;  %v6038_v14 = vpack.c.bf16 %v968_v10, %v967_v9  ;;  %v6047_v18 = vpack.c.bf16 %v1282_v17, %v1281_v16  ;;  %v1283_v19 = vld [vmem:[%s7514_s5 + $0x10] sm:$0xff]  ;;  %v5130_v38 = vld [vmem:[%s7467_s7 + $0x3] ss:$0 sm:$0xff] }
  0x30   : > { %v6068_v15 = vpack.c.bf16 %v1296_v13, %v1295_v11  ;;  %v1291_v26 = vld [vmem:[%s7514_s5 + $0x50] sm:$0xff]  ;;  %v5127_v45 = vld [vmem:[%s7467_s7] ss:$0 sm:$0xff]  ;;  %v5128_v54 = vld [vmem:[%s7467_s7 + $0x1] ss:$0 sm:$0xff] }
  0x31   : > { %v5119_v49 = vld [vmem:[%s7466_s6] ss:$0 sm:$0xff]  ;;  %v5120_v56 = vld [vmem:[%s7466_s6 + $0x1] ss:$0 sm:$0xff] }
  0xb5   : > { %v604_v2 = vpop.xlane.xlu0 %603 }
  0xb6   : > { %v606_v3 = vmul.f32 0.03125, %v604_v2  ;;  %v6056_v2 = vpack.c.bf16 %v1288_v63, %v1287_v62  ;;  %v5121_v62 = vld [vmem:[%s7466_s6 + $0x2] ss:$0 sm:$0xff] }
  0xb8   : > { %v607_v4 = vsub.f32 %v6515_v0, %v606_v3  ;;  %v965_v3 = vld [vmem:[%s7511_s4 + $0x40] sm:$0xff] }
  0xba   : > { %v608_v5 = vmul.f32 %v607_v4, %v607_v4 }
  0xbc   : > { %v609_v6 = vsel %vm601_vm0, %v608_v5, 0.0  ;;  %v1293_v5 = vld [vmem:[%s7514_s5 + $0x60] sm:$0xff] }
  0xbd   : > { %610 = vadd.xlane.f32.xlu0 %v609_v6  ;;  %v1294_v6 = vld [vmem:[%s7514_s5 + $0x68] sm:$0xff] }
  0xbe   : > { %v6065_v8 = vpack.c.bf16 %v1294_v6, %v1293_v5 }
 0x14a   : > { %v611_v21 = vpop.xlane.xlu0 %610 }
 0x14b   : > { %v612_v22 = vmul.f32 0.03125, %v611_v21  ;;  %v1284_v21 = vld [vmem:[%s7514_s5 + $0x18] sm:$0xff] }
 0x14d   : > { %v613_v23 = vadd.f32 1e-05, %v612_v22  ;;  %v6050_v22 = vpack.c.bf16 %v1284_v21, %v1283_v19 }
 0x14f   : > { %6244 = vrsqrt.f32 %v613_v23  ;;  %v1289_v23 = vld [vmem:[%s7514_s5 + $0x40] sm:$0xff] }
 0x159   : > { %v6245_v24 = vpop.eup %6244 }
 0x15a   : > { %v615_v27 = vmul.f32 %v6245_v24, %v607_v4  ;;  %v966_v4 = vld [vmem:[%s7511_s4 + $0x48] sm:$0xff] }
 0x15b   : > { %v6035_v7 = vpack.c.bf16 %v966_v4, %v965_v3  ;;  %v1290_v24 = vld [vmem:[%s7514_s5 + $0x48] sm:$0xff]  ;;  %v5135_v4 = vld [vmem:[%s7468_s8] ss:$0 sm:$0xff] }
 0x15c   : > { %v622_v32 = vmul.f32 %v5117_v25, %v615_v27  ;;  %v6059_v25 = vpack.c.bf16 %v1290_v24, %v1289_v23  ;;  %v1292_v27 = vld [vmem:[%s7514_s5 + $0x58] sm:$0xff] }
 0x15d   : > { %v6062_v28 = vpack.c.bf16 %v1292_v27, %v1291_v26 }
 0x15e   : > { %v6576_v36 = vadd.f32 %v5118_v31, %v622_v32 }
 0x160   : > { %5531 = vmatmul.mubr.msk.f32.vlgmr.msra.gmra.mrb[0].mxu0 %vm601_vm0, %v6576_v36  ;;  %5564 = vmatmul.mubr.msk.f32.vlgmr.msra.gmra.mrb[0].mxu1 %vm601_vm0, %v6576_v36 }
 0x161   : > { %6006 = vmatpush3.bf16.msra.mxu0 %v6005_v33  ;;  %6030 = vmatpush3.bf16.msra.mxu1 %v6029_v34 }
 0x162   : > { %6007 = vmatprep.subr.bf16.mxu0 %v6358_v12  ;;  %6031 = vmatprep.subr.bf16.mxu1 %v6358_v12 }
 0x163   : > { %5541 = vmatprep.mubr.msk.f32.mxu0 %vm6359_vm1, %v6360_v20  ;;  %5585 = vmatprep.mubr.msk.f32.mxu1 %vm6359_vm1, %v6360_v20 }
 0x165   : > { %6009 = vmatpush3.bf16.msra.mxu0 %v6008_v40  ;;  %6033 = vmatpush3.bf16.msra.mxu1 %v6032_v41 }
 0x166   : > { %6010 = vmatprep.subr.bf16.mxu0 %v6358_v12  ;;  %6040 = vmatprep.subr.bf16.mxu1 %v6358_v12 }
 0x168   : > { %5542 = vmatmul.mubr.msk.f32.vlgmr.msra.gmra.mrb[2].mxu0 %vm601_vm0, %v6576_v36  ;;  %5586 = vmatmul.mubr.msk.f32.vlgmr.msra.gmra.mrb[2].mxu1 %vm601_vm0, %v6576_v36 }
 0x169   : > { %6012 = vmatpush3.bf16.msra.mxu0 %v6011_v46  ;;  %6042 = vmatpush3.bf16.msra.mxu1 %v6041_v47  ;;  %v5136_v46 = vld [vmem:[%s7468_s8 + $0x1] ss:$0 sm:$0xff] }
 0x16a   : > { %6013 = vmatprep.subr.bf16.mxu0 %v6358_v12  ;;  %6043 = vmatprep.subr.bf16.mxu1 %v6358_v12 }
 0x16b   : > { %5552 = vmatprep.mubr.msk.f32.mxu0 %vm6359_vm1, %v6360_v20  ;;  %5607 = vmatprep.mubr.msk.f32.mxu1 %vm6359_vm1, %v6360_v20 }
 0x16d   : > { %6015 = vmatpush3.bf16.msra.mxu0 %v6014_v52  ;;  %6045 = vmatpush3.bf16.msra.mxu1 %v6044_v53 }
 0x16e   : > { %6022 = vmatprep.subr.bf16.mxu0 %v6358_v12  ;;  %6052 = vmatprep.subr.bf16.mxu1 %v6358_v12 }
 0x170   : > { %5553 = vmatmul.mubr.msk.f32.vlgmr.msra.gmra.mrb[4].mxu0 %vm601_vm0, %v6576_v36  ;;  %5608 = vmatmul.mubr.msk.f32.vlgmr.msra.gmra.mrb[4].mxu1 %vm601_vm0, %v6576_v36 }
 0x171   : > { %6024 = vmatpush3.bf16.msra.mxu0 %v6023_v58  ;;  %6054 = vmatpush3.bf16.msra.mxu1 %v6053_v59  ;;  %v5129_v58 = vld [vmem:[%s7467_s7 + $0x2] ss:$0 sm:$0xff] }
 0x172   : > { %6025 = vmatprep.subr.bf16.mxu0 %v6358_v12  ;;  %6055 = vmatprep.subr.bf16.mxu1 %v6358_v12 }
 0x173   : > { %5574 = vmatprep.mubr.msk.f32.mxu0 %vm6359_vm1, %v6360_v20  ;;  %5629 = vmatprep.mubr.msk.f32.mxu1 %vm6359_vm1, %v6360_v20 }
 0x175   : > { %6027 = vmatpush3.bf16.msra.mxu0 %v6026_v1  ;;  %6057 = vmatpush3.bf16.msra.mxu1 %v6056_v2 }
 0x176   : > { %6034 = vmatprep.subr.bf16.mxu0 %v6358_v12  ;;  %6064 = vmatprep.subr.bf16.mxu1 %v6358_v12 }
 0x178   : > { %5575 = vmatmul.mubr.msk.f32.vlgmr.msra.gmra.mrb[6].mxu0 %vm601_vm0, %v6576_v36  ;;  %5630 = vmatmul.mubr.msk.f32.vlgmr.msra.gmra.mrb[6].mxu1 %vm601_vm0, %v6576_v36 }
 0x179   : > { %6036 = vmatpush3.bf16.msra.mxu0 %v6035_v7  ;;  %6066 = vmatpush3.bf16.msra.mxu1 %v6065_v8 }
 0x17a   : > { %6037 = vmatprep.subr.bf16.mxu0 %v6358_v12  ;;  %6067 = vmatprep.subr.bf16.mxu1 %v6358_v12 }
 0x17b   : > { %5596 = vmatprep.mubr.msk.f32.mxu0 %vm6359_vm1, %v6360_v20  ;;  %5651 = vmatprep.mubr.msk.f32.mxu1 %vm6359_vm1, %v6360_v20 }
 0x17d   : > { %6039 = vmatpush3.bf16.msra.mxu0 %v6038_v14  ;;  %6069 = vmatpush3.bf16.msra.mxu1 %v6068_v15 }
 0x17e   : > { %6046 = vmatprep.subr.bf16.mxu0 %v6358_v12  ;;  %5669 = vmatprep.subr.mxu1 %v6360_v20 }
 0x180   : > { %5597 = vmatmul.mubr.msk.f32.vlgmr.msra.gmra.mrb[8].mxu0 %vm601_vm0, %v6576_v36  ;;  %5652 = vmatmul.mubr.msk.f32.vlgmr.msra.gmra.mrb[8].mxu1 %vm601_vm0, %v6576_v36 }
 0x181   : > { %6048 = vmatpush3.bf16.msra.mxu0 %v6047_v18  ;;  %5618 = vmatprep.mubr.msk.f32.mxu0 %vm6359_vm1, %v6360_v20 }
 0x182   : > { %6049 = vmatprep.subr.bf16.mxu0 %v6358_v12  ;;  %5671 = vmatprep.mubr.msk.f32.mxu1 %vm6359_vm1, %v6360_v20 }
 0x185   : > { %6051 = vmatpush3.bf16.msra.mxu0 %v6050_v22 }
 0x186   : > { %6058 = vmatprep.subr.bf16.mxu0 %v6358_v12 }
 0x188   : > { %5619 = vmatmul.mubr.msk.f32.vlgmr.msra.gmra.mrb[10].mxu0 %vm601_vm0, %v6576_v36 }
 0x189   : > { %6060 = vmatpush3.bf16.msra.mxu0 %v6059_v25  ;;  %5640 = vmatprep.mubr.msk.f32.mxu0 %vm6359_vm1, %v6360_v20 }
 0x18a   : > { %6061 = vmatprep.subr.bf16.mxu0 %v6358_v12 }
 0x18d   : > { %6063 = vmatpush3.bf16.msra.mxu0 %v6062_v28 }
 0x18e   : > { %5654 = vmatprep.subr.mxu0 %v6360_v20 }
 0x190   : > { %5641 = vmatmul.mubr.msk.f32.vlgmr.msra.gmra.mrb[12].mxu0 %vm601_vm0, %v6576_v36  ;;  %v5122_v36 = vld [vmem:[%s7466_s6 + $0x3] ss:$0 sm:$0xff] }
 0x191   : > { %5656 = vmatprep.mubr.msk.f32.mxu0 %vm6359_vm1, %v6360_v20 }
 0x233   : > { %v743_v29 = vpop.f32.mrb[0].mxu0  ;;  %v953_v30 = vpop.f32.mrb[0].mxu1 }
 0x234   : > { %v5532_v31 = vpop.f32.mrb[1].mxu0  ;;  %v5565_v32 = vpop.f32.mrb[1].mxu1  ;;  %v954_v44 = vadd.f32 %v5122_v36, %v953_v30  ;;  %v744_v55 = vadd.f32 %v5119_v49, %v743_v29 }
 0x23b   : > { %v813_v33 = vpop.f32.mrb[2].mxu0  ;;  %v1137_v34 = vpop.f32.mrb[2].mxu1 }
 0x23c   : > { %v5543_v35 = vpop.f32.mrb[3].mxu0  ;;  %v5587_v37 = vpop.f32.mrb[3].mxu1  ;;  %v1138_v57 = vadd.f32 %v5128_v54, %v1137_v34  ;;  %v814_v59 = vadd.f32 %v5120_v56, %v813_v33  ;;  %v5138_v56 = vld [vmem:[%s7468_s8 + $0x3] ss:$0 sm:$0xff] }
 0x243   : > { %v883_v39 = vpop.f32.mrb[4].mxu0  ;;  %v1277_v40 = vpop.f32.mrb[4].mxu1 }
 0x244   : > { %v1278_v41 = vadd.f32 %v5130_v38, %v1277_v40  ;;  %v5554_v42 = vpop.f32.mrb[5].mxu0  ;;  %v5609_v43 = vpop.f32.mrb[5].mxu1  ;;  %v884_v3 = vadd.f32 %v5121_v62, %v883_v39 }
 0x246   : > { %5670 = vmatpush3.xpose.msk.msra.mxu1 %vm1605_vm2, %v1278_v41 }
 0x247   : > { %5679 = vmatprep.subr.mxu1 %v6360_v20 }
 0x249   : > { %5672 = vmatmul.mubr.msk.f32.vlgmr.msra.gmra.mrb[10].mxu1 %vm1605_vm2, %v954_v44 }
 0x24a   : > { %5681 = vmatprep.mubr.msk.f32.mxu1 %vm6359_vm1, %v6360_v20 }
 0x24b   : > { %v1067_v47 = vpop.f32.mrb[6].mxu0  ;;  %v1461_v48 = vpop.f32.mrb[6].mxu1 }
 0x24c   : > { %v1068_v50 = vadd.f32 %v5127_v45, %v1067_v47  ;;  %v1462_v51 = vadd.f32 %v5136_v46, %v1461_v48  ;;  %v5576_v52 = vpop.f32.mrb[7].mxu0  ;;  %v5631_v53 = vpop.f32.mrb[7].mxu1 }
 0x24d   : > { %v5137_v52 = vld [vmem:[%s7468_s8 + $0x2] ss:$0 sm:$0xff] }
 0x24e   : > { %5655 = vmatpush3.xpose.msk.msra.mxu0 %vm1605_vm2, %v1068_v50  ;;  %5680 = vmatpush3.msra.mxu1 %v1462_v51 }
 0x24f   : > { %5659 = vmatprep.subr.mxu0 %v6360_v20  ;;  %5689 = vmatprep.subr.mxu1 %v6360_v20 }
 0x251   : > { %5657 = vmatmul.mubr.msk.f32.vlgmr.msra.gmra.mrb[14].mxu0 %vm1605_vm2, %v744_v55 }
 0x252   : > { %5660 = vmatpush3.xpose.msk.msra.mxu0 %vm1605_vm2, %v1138_v57  ;;  %5661 = vmatprep.mubr.msk.f32.mxu0 %vm6359_vm1, %v6360_v20 }
 0x253   : > { %v1207_v60 = vpop.f32.mrb[8].mxu0  ;;  %v6787_v61 = vpop.f32.mrb[8].mxu1  ;;  %5664 = vmatprep.subr.mxu0 %v6360_v20 }
 0x254   : > { %v1208_v63 = vadd.f32 %v5129_v58, %v1207_v60  ;;  %v5598_v1 = vpop.f32.mrb[9].mxu0  ;;  %v5653_v2 = vpop.f32.mrb[9].mxu1 }
 0x255   : > { %5662 = vmatmul.mubr.msk.f32.vlgmr.msra.gmra.mrb[16].mxu0 %vm1605_vm2, %v814_v59  ;;  %v1602_v59 = vadd.f32 %v5138_v56, %v6787_v61  ;;  %v2250_v61 = vld [vmem:[%s7469_s9] sm:$0xff]  ;;  %v2251_v2 = vld [vmem:[%s7469_s9 + $0x8] sm:$0xff]  ;;  %v2704_v56 = vld [vmem:[%s7475_s15 + $0x10] sm:$0xff] }
 0x256   : > { %5665 = vmatpush3.xpose.msk.msra.mxu0 %vm1605_vm2, %v1208_v63  ;;  %5666 = vmatprep.mubr.msk.f32.mxu0 %vm6359_vm1, %v6360_v20 }
 0x257   : > { %5674 = vmatprep.subr.mxu0 %v6360_v20 }
 0x259   : > { %5667 = vmatmul.mubr.msk.f32.vlgmr.msra.gmra.mrb[18].mxu0 %vm1605_vm2, %v884_v3  ;;  %v2252_v3 = vld [vmem:[%s7469_s9 + $0x10] sm:$0xff] }
 0x25a   : > { %5676 = vmatprep.mubr.msk.f32.mxu0 %vm6359_vm1, %v6360_v20 }
 0x25b   : > { %v1391_v5 = vpop.f32.mrb[10].mxu0 }
 0x25c   : > { %v1392_v6 = vadd.f32 %v5135_v4, %v1391_v5  ;;  %v5620_v7 = vpop.f32.mrb[11].mxu0 }
 0x25e   : > { %5675 = vmatpush3.msra.mxu0 %v1392_v6  ;;  %v2253_v6 = vld [vmem:[%s7469_s9 + $0x18] sm:$0xff] }
 0x25f   : > { %5684 = vmatprep.subr.mxu0 %v6360_v20 }
 0x263   : > { %v1531_v8 = vpop.f32.mrb[12].mxu0 }
 0x264   : > { %v5642_v9 = vpop.f32.mrb[13].mxu0  ;;  %v1532_v55 = vadd.f32 %v5137_v52, %v1531_v8 }
 0x31c   : > { %v1906_v10 = vpop.f32.mrb[10].mxu1 }
 0x31d   : > { %v5673_v11 = vpop.f32.mrb[11].mxu1  ;;  %v1913_v21 = vmul.f32 0.35355338, %v1906_v10 }
 0x31f   : > { %v1923_v26 = vsel %vm1605_vm2, %v1913_v21, -inf }
 0x324   : > { %v1678_v13 = vpop.f32.mrb[14].mxu0 }
 0x325   : > { %v1910_v14 = vmul.f32 0.35355338, %v1678_v13  ;;  %v5658_v15 = vpop.f32.mrb[15].mxu0 }
 0x327   : > { %v1914_v16 = vsel %vm1605_vm2, %v1910_v14, -inf }
 0x328   : > { %1915 = vmax.xlane.f32.xlu1 %v1914_v16  ;;  %v1754_v17 = vpop.f32.mrb[16].mxu0 }
 0x329   : > { %v1911_v18 = vmul.f32 0.35355338, %v1754_v17  ;;  %v5663_v19 = vpop.f32.mrb[17].mxu0 }
 0x32b   : > { %v1917_v22 = vsel %vm1605_vm2, %v1911_v18, -inf }
 0x32c   : > { %1918 = vmax.xlane.f32.xlu1 %v1917_v22  ;;  %v1830_v23 = vpop.f32.mrb[18].mxu0 }
 0x32d   : > { %v1912_v24 = vmul.f32 0.35355338, %v1830_v23  ;;  %v5668_v25 = vpop.f32.mrb[19].mxu0 }
 0x32f   : > { %v1920_v27 = vsel %vm1605_vm2, %v1912_v24, -inf }
 0x330   : > { %1924 = vmax.xlane.f32.xlu1 %v1923_v26  ;;  %1921 = vmax.xlane.f32.xlu0 %v1920_v27 }
 0x3b5   : > { %v1916_v28 = vpop.xlane.xlu1 %1915 }
 0x3b6   : > { %v1926_v29 = vsub.f32 %v1910_v14, %v1916_v28 }
 0x3b8   : > { %v1930_v30 = vmul.f32 1.442695, %v1926_v29 }
 0x3b9   : > { %v1919_v31 = vpop.xlane.xlu1 %1918 }
 0x3ba   : > { %6246 = vpow2.f32 %v1930_v30  ;;  %v1927_v32 = vsub.f32 %v1911_v18, %v1919_v31  ;;  %v5159_v30 = vld [vmem:[%s7470_s10] ss:$0 sm:$0xff] }
 0x3bc   : > { %v1932_v33 = vmul.f32 1.442695, %v1927_v32 }
 0x3bd   : > { %v1925_v34 = vpop.xlane.xlu1 %1924  ;;  %v1922_v35 = vpop.xlane.xlu0 %1921 }
 0x3be   : > { %6248 = vpow2.f32 %v1932_v33  ;;  %v1929_v37 = vsub.f32 %v1913_v21, %v1925_v34  ;;  %v1928_v38 = vsub.f32 %v1912_v24, %v1922_v35 }
 0x3c0   : > { %v1936_v39 = vmul.f32 1.442695, %v1929_v37  ;;  %v1934_v40 = vmul.f32 1.442695, %v1928_v38 }
 0x3c2   : > { %6250 = vpow2.f32 %v1936_v39 }
 0x3c3   : > { %6252 = vpow2.f32 %v1934_v40  ;;  %v2591_v40 = vld [vmem:[%s7473_s13] sm:$0xff] }
 0x3c4   : > { %v6247_v36 = vpop.eup %6246 }
 0x3c5   : > { %v1938_v41 = vsel %vm1605_vm2, %v6247_v36, 0.0 }
 0x3c6   : > { %1939 = vadd.xlane.f32.xlu0 %v1938_v41  ;;  %v2593_v41 = vld [vmem:[%s7473_s13 + $0x10] sm:$0xff] }
 0x3c8   : > { %v6249_v42 = vpop.eup %6248 }
 0x3c9   : > { %v1941_v43 = vsel %vm1605_vm2, %v6249_v42, 0.0 }
 0x3ca   : > { %1942 = vadd.xlane.f32.xlu1 %v1941_v43 }
 0x3cc   : > { %v6251_v44 = vpop.eup %6250 }
 0x3cd   : > { %v6253_v45 = vpop.eup %6252  ;;  %v1947_v46 = vsel %vm1605_vm2, %v6251_v44, 0.0 }
 0x3ce   : > { %1948 = vadd.xlane.f32.xlu1 %v1947_v46  ;;  %v1944_v47 = vsel %vm1605_vm2, %v6253_v45, 0.0 }
 0x3cf   : > { %1945 = vadd.xlane.f32.xlu0 %v1944_v47 }
 0x453   : > { %v1940_v48 = vpop.xlane.xlu0 %1939 }
 0x454   : > { %6254 = vrcp.f32 %v1940_v48  ;;  %v5160_v48 = vld [vmem:[%s7471_s11] ss:$0 sm:$0xff] }
 0x457   : > { %v1943_v49 = vpop.xlane.xlu1 %1942 }
 0x458   : > { %6256 = vrcp.f32 %v1943_v49 }
 0x45b   : > { %v1949_v50 = vpop.xlane.xlu1 %1948 }
 0x45c   : > { %6258 = vrcp.f32 %v1949_v50  ;;  %v1946_v51 = vpop.xlane.xlu0 %1945  ;;  %v5161_v50 = vld [vmem:[%s7472_s12] ss:$0 sm:$0xff] }
 0x45d   : > { %6260 = vrcp.f32 %v1946_v51 }
 0x45e   : > { %v6255_v53 = vpop.eup %6254 }
 0x45f   : > { %v1954_v54 = vmul.f32 %v6255_v53, %v6247_v36  ;;  %v2702_v53 = vld [vmem:[%s7475_s15] sm:$0xff] }
 0x461   : > { %5677 = vmatmul.mubr.msk.f32.vlgmr.msra.gmra.mrb[20].mxu0 %vm1605_vm2, %v1954_v54  ;;  %v2703_v54 = vld [vmem:[%s7475_s15 + $0x8] sm:$0xff] }
 0x462   : > { %v6257_v57 = vpop.eup %6256  ;;  %5685 = vmatpush3.msra.mxu0 %v1532_v55  ;;  %5686 = vmatprep.mubr.msk.f32.mxu0 %vm6359_vm1, %v6360_v20  ;;  %v6077_v55 = vpack.c.bf16 %v2703_v54, %v2702_v53 }
 0x463   : > { %v1955_v58 = vmul.f32 %v6257_v57, %v6249_v42  ;;  %5694 = vmatprep.subr.mxu0 %v6360_v20  ;;  %v2594_v42 = vld [vmem:[%s7473_s13 + $0x18] sm:$0xff] }
 0x464   : > { %v6074_v43 = vpack.c.bf16 %v2594_v42, %v2593_v41  ;;  %v2705_v57 = vld [vmem:[%s7475_s15 + $0x18] sm:$0xff] }
 0x465   : > { %5682 = vmatmul.mubr.msk.f32.vlgmr.msra.gmra.mrb[12].mxu1 %vm1605_vm2, %v1955_v58  ;;  %v6080_v58 = vpack.c.bf16 %v2705_v57, %v2704_v56  ;;  %v5169_v56 = vld [vmem:[%s7509_s2 + $0x80] sm:$0xff] }
 0x466   : > { %v6259_v60 = vpop.eup %6258  ;;  %5690 = vmatpush3.msra.mxu1 %v1602_v59  ;;  %5691 = vmatprep.mubr.msk.f32.mxu1 %vm6359_vm1, %v6360_v20  ;;  %v2706_v59 = vld [vmem:[%s7475_s15 + $0x20] sm:$0xff] }
 0x467   : > { %v6261_v62 = vpop.eup %6260  ;;  %v1957_v63 = vmul.f32 %v6259_v60, %v6251_v44  ;;  %5699 = vmatprep.subr.mxu1 %v6360_v20  ;;  %v2707_v60 = vld [vmem:[%s7475_s15 + $0x28] sm:$0xff]  ;;  %v5197_v57 = vld [vmem:[%s7511_s4 + $0x80] sm:$0xff] }
 0x468   : > { %v1956_v1 = vmul.f32 %v6261_v62, %v6253_v45  ;;  %v6083_v62 = vpack.c.bf16 %v2707_v60, %v2706_v59  ;;  %v5198_v59 = vld [vmem:[%s7511_s4 + $0x88] sm:$0xff] }
 0x469   : > { %5692 = vmatmul.mubr.msk.f32.vlgmr.msra.gmra.mrb[14].mxu1 %vm1605_vm2, %v1957_v63  ;;  %v2708_v63 = vld [vmem:[%s7475_s15 + $0x30] sm:$0xff]  ;;  %v6125_v60 = vpack.c.bf16 %v5198_v59, %v5197_v57  ;;  %v5209_v57 = vld [vmem:[%s7511_s4 + $0xe0] sm:$0xff] }
 0x46a   : > { %5687 = vmatmul.mubr.msk.f32.vlgmr.msra.gmra.mrb[22].mxu0 %vm1605_vm2, %v1956_v1  ;;  %5701 = vmatprep.mubr.msk.f32.mxu1 %vm6359_vm1, %v6360_v20  ;;  %v2709_v1 = vld [vmem:[%s7475_s15 + $0x38] sm:$0xff] }
 0x46b   : > { %5696 = vmatprep.mubr.msk.f32.mxu0 %vm6359_vm1, %v6360_v20  ;;  %5695 = vmatpush3.msra.mxu0 %v2250_v61  ;;  %v6086_v61 = vpack.c.bf16 %v2709_v1, %v2708_v63  ;;  %v5172_v63 = vld [vmem:[%s7509_s2 + $0x98] sm:$0xff]  ;;  %v5199_v1 = vld [vmem:[%s7511_s4 + $0x90] sm:$0xff] }
 0x46c   : > { %5704 = vmatprep.subr.mxu0 %v6360_v20  ;;  %5700 = vmatpush3.msra.mxu1 %v2251_v2  ;;  %v2710_v2 = vld [vmem:[%s7475_s15 + $0x40] sm:$0xff] }
 0x46d   : > { %5709 = vmatprep.subr.mxu1 %v6360_v20 }
 0x534   : > { %v2027_v4 = vpop.f32.mrb[20].mxu0 }
 0x535   : > { %v5678_v5 = vpop.f32.mrb[21].mxu0  ;;  %5697 = vmatmul.mubr.msk.f32.vlgmr.msra.gmra.mrb[24].mxu0 %vm1605_vm2, %v2027_v4 }
 0x536   : > { %5705 = vmatpush3.msra.mxu0 %v2252_v3  ;;  %5706 = vmatprep.mubr.msk.f32.mxu0 %vm6359_vm1, %v6360_v20  ;;  %v2711_v3 = vld [vmem:[%s7475_s15 + $0x48] sm:$0xff]  ;;  %v2712_v5 = vld [vmem:[%s7475_s15 + $0x50] sm:$0xff] }
 0x537   : > { %6070 = vmatprep.subr.bf16.mxu0 %v6358_v12  ;;  %v6089_v4 = vpack.c.bf16 %v2711_v3, %v2710_v2  ;;  %v5200_v2 = vld [vmem:[%s7511_s4 + $0x98] sm:$0xff] }
 0x538   : > { %v2100_v7 = vpop.f32.mrb[12].mxu1  ;;  %v6128_v3 = vpack.c.bf16 %v5200_v2, %v5199_v1  ;;  %v5229_v1 = vld [vmem:[%s7514_s5 + $0xa0] sm:$0xff] }
 0x539   : > { %v5683_v8 = vpop.f32.mrb[13].mxu1  ;;  %5702 = vmatmul.mubr.msk.f32.vlgmr.msra.gmra.mrb[16].mxu1 %vm1605_vm2, %v2100_v7 }
 0x53a   : > { %5710 = vmatpush3.msra.mxu1 %v2253_v6  ;;  %5711 = vmatprep.mubr.msk.f32.mxu1 %vm6359_vm1, %v6360_v20  ;;  %v2713_v6 = vld [vmem:[%s7475_s15 + $0x58] sm:$0xff]  ;;  %v2714_v8 = vld [vmem:[%s7475_s15 + $0x60] sm:$0xff] }
 0x53b   : > { %6076 = vmatprep.subr.bf16.mxu1 %v6358_v12  ;;  %v6092_v7 = vpack.c.bf16 %v2713_v6, %v2712_v5 }
 0x53c   : > { %v2246_v9 = vpop.f32.mrb[14].mxu1 }
 0x53d   : > { %v2173_v10 = vpop.f32.mrb[22].mxu0  ;;  %v5693_v11 = vpop.f32.mrb[15].mxu1  ;;  %5712 = vmatmul.mubr.msk.f32.vlgmr.msra.gmra.mrb[18].mxu1 %vm1605_vm2, %v2246_v9  ;;  %v2715_v9 = vld [vmem:[%s7475_s15 + $0x68] sm:$0xff] }
 0x53e   : > { %v5688_v13 = vpop.f32.mrb[23].mxu0  ;;  %5707 = vmatmul.mubr.msk.f32.vlgmr.msra.gmra.mrb[26].mxu0 %vm1605_vm2, %v2173_v10  ;;  %5757 = vmatprep.mubr.msk.f32.mxu1 %vm6359_vm1, %v6360_v20  ;;  %v6095_v10 = vpack.c.bf16 %v2715_v9, %v2714_v8  ;;  %v2716_v11 = vld [vmem:[%s7475_s15 + $0x70] sm:$0xff]  ;;  %v5167_v8 = vld [vmem:[%s7510_s25 + $0x1] ss:$0 sm:$0xff] }
 0x53f   : > { %5722 = vmatprep.mubr.msk.f32.mxu0 %vm6359_vm1, %v6360_v20  ;;  %6078 = vmatpush3.bf16.msra.mxu1 %v6077_v55  ;;  %v2717_v13 = vld [vmem:[%s7475_s15 + $0x78] sm:$0xff]  ;;  %v5173_v9 = vld [vmem:[%s7509_s2 + $0xa0] sm:$0xff] }
 0x540   : > { %6079 = vmatprep.subr.bf16.mxu1 %v6358_v12 }
 0x543   : > { %6081 = vmatpush3.bf16.msra.mxu1 %v6080_v58 }
 0x544   : > { %6082 = vmatprep.subr.bf16.mxu1 %v6358_v12 }
 0x547   : > { %6084 = vmatpush3.bf16.msra.mxu1 %v6083_v62  ;;  %v5171_v62 = vld [vmem:[%s7509_s2 + $0x90] sm:$0xff] }
 0x548   : > { %6085 = vmatprep.subr.bf16.mxu1 %v6358_v12 }
 0x54b   : > { %6087 = vmatpush3.bf16.msra.mxu1 %v6086_v61  ;;  %v6104_v61 = vpack.c.bf16 %v5172_v63, %v5171_v62  ;;  %v5212_v62 = vld [vmem:[%s7511_s4 + $0xf8] sm:$0xff] }
 0x54c   : > { %6088 = vmatprep.subr.bf16.mxu1 %v6358_v12 }
 0x54f   : > { %6090 = vmatpush3.bf16.msra.mxu1 %v6089_v4 }
 0x550   : > { %6091 = vmatprep.subr.bf16.mxu1 %v6358_v12 }
 0x553   : > { %6093 = vmatpush3.bf16.msra.mxu1 %v6092_v7 }
 0x554   : > { %6094 = vmatprep.subr.bf16.mxu1 %v6358_v12 }
 0x557   : > { %6096 = vmatpush3.bf16.msra.mxu1 %v6095_v10 }
 0x558   : > { %6097 = vmatprep.subr.bf16.mxu1 %v6358_v12 }
 0x608   : > { %v2323_v14 = vpop.f32.mrb[24].mxu0 }
 0x609   : > { %v5698_v15 = vpop.f32.mrb[25].mxu0  ;;  %v2546_v17 = vsel %vm601_vm0, %v2323_v14, 0.0  ;;  %v6098_v14 = vpack.c.bf16 %v2717_v13, %v2716_v11  ;;  %v5174_v11 = vld [vmem:[%s7509_s2 + $0xa8] sm:$0xff]  ;;  %v5205_v13 = vld [vmem:[%s7511_s4 + $0xc0] sm:$0xff] }
 0x60a   : > { %v5162_v15 = vld [vmem:[%s7474_s14] ss:$0 sm:$0xff] }
 0x60b   : > { %6099 = vmatpush3.bf16.msra.mxu1 %v6098_v14  ;;  %v5206_v14 = vld [vmem:[%s7511_s4 + $0xc8] sm:$0xff] }
 0x60c   : > { %v2396_v16 = vpop.f32.mrb[16].mxu1  ;;  %6124 = vmatprep.subr.bf16.mxu1 %v6358_v12 }
 0x60d   : > { %v2547_v18 = vsel %vm601_vm0, %v2396_v16, 0.0  ;;  %v5703_v19 = vpop.f32.mrb[17].mxu1 }
 0x60e   : > { %v2548_v21 = vadd.f32 %v2547_v18, %v2546_v17 }
 0x610   : > { %v2542_v22 = vpop.f32.mrb[18].mxu1 }
 0x611   : > { %v2469_v23 = vpop.f32.mrb[26].mxu0  ;;  %v5713_v24 = vpop.f32.mrb[19].mxu1  ;;  %v2551_v28 = vsel %vm601_vm0, %v2542_v22, 0.0 }
 0x612   : > { %v2549_v25 = vsel %vm601_vm0, %v2469_v23, 0.0  ;;  %v5708_v26 = vpop.f32.mrb[27].mxu0 }
 0x613   : > { %v2550_v27 = vadd.f32 %v2549_v25, %v2548_v21 }
 0x615   : > { %v2552_v29 = vadd.f32 %v2551_v28, %v2550_v27 }
 0x617   : > { %v2553_v31 = vadd.f32 %v2552_v29, %v6515_v0  ;;  %v2592_v0 = vld [vmem:[%s7473_s13 + $0x8] sm:$0xff] }
 0x618   : > { %v6071_v36 = vpack.c.bf16 %v2592_v0, %v2591_v40 }
 0x619   : > { %v6870_v32 = vadd.f32 %v5159_v30, %v2553_v31 }
 0x61a   : > { %6072 = vmatpush3.bf16.msra.mxu0 %v6071_v36 }
 0x61b   : > { %v2564_v33 = vsel %vm601_vm0, %v6870_v32, 0.0  ;;  %6073 = vmatprep.subr.bf16.mxu0 %v6358_v12 }
 0x61c   : > { %2565 = vadd.xlane.f32.xlu0 %v2564_v33 }
 0x61e   : > { %6075 = vmatpush3.bf16.msra.mxu0 %v6074_v43 }
 0x61f   : > { %6100 = vmatprep.subr.bf16.mxu0 %v6358_v12 }
 0x6a9   : > { %v2566_v34 = vpop.xlane.xlu0 %2565 }
 0x6aa   : > { %v2567_v35 = vmul.f32 0.03125, %v2566_v34 }
 0x6ac   : > { %v2568_v37 = vsub.f32 %v6870_v32, %v2567_v35 }
 0x6ae   : > { %v2569_v38 = vmul.f32 %v2568_v37, %v2568_v37 }
 0x6b0   : > { %v2570_v39 = vsel %vm601_vm0, %v2569_v38, 0.0 }
 0x6b1   : > { %2571 = vadd.xlane.f32.xlu1 %v2570_v39 }
 0x73e   : > { %v2572_v44 = vpop.xlane.xlu1 %2571 }
 0x73f   : > { %v2573_v45 = vmul.f32 0.03125, %v2572_v44 }
 0x741   : > { %v2574_v46 = vadd.f32 1e-05, %v2573_v45 }
 0x743   : > { %6262 = vrsqrt.f32 %v2574_v46  ;;  %v5164_v46 = vld [vmem:[%s7476_s16] ss:$0 sm:$0xff] }
 0x74d   : > { %v6263_v47 = vpop.eup %6262 }
 0x74e   : > { %v2576_v49 = vmul.f32 %v6263_v47, %v2568_v37 }
 0x750   : > { %v2583_v51 = vmul.f32 %v5160_v48, %v2576_v49 }
 0x752   : > { %v2590_v52 = vadd.f32 %v5161_v50, %v2583_v51 }
 0x754   : > { %5723 = vmatmul.mubr.msk.f32.vlgmr.msra.gmra.mrb[28].mxu0 %vm601_vm0, %v2590_v52 }
 0x755   : > { %5768 = vmatprep.mubr.msk.f32.mxu0 %vm6359_vm1, %v6360_v20 }
 0x827   : > { %v2671_v16 = vpop.f32.mrb[28].mxu0 }
 0x828   : > { %v2672_v17 = vadd.f32 %v5162_v15, %v2671_v16  ;;  %v5724_v18 = vpop.f32.mrb[29].mxu0  ;;  %v5168_v15 = vld [vmem:[%s7513_s18 + $0x1] ss:$0 sm:$0xff] }
 0x829   : > { %v6137_v18 = vpack.c.bf16 %v5206_v14, %v5205_v13  ;;  %v5217_v13 = vld [vmem:[%s7467_s7 + $0x4] ss:$0 sm:$0xff] }
 0x82a   : > { %v2676_v19 = vmul.f32 0.70710677, %v2672_v17  ;;  %v2675_v42 = vmul.f32 0.5, %v2672_v17  ;;  %v6107_v17 = vpack.c.bf16 %v5174_v11, %v5173_v9  ;;  %v5239_v9 = vld [vmem:[%s7514_s5 + $0xf0] sm:$0xff] }
 0x82c   : > { %v2677_v21 = vand.u32 2147483647, %v2676_v19  ;;  %vm2697_vm3 = vcmp.ge.f32.partialorder %v2676_v19, 0.0  ;;  %v5175_v19 = vld [vmem:[%s7509_s2 + $0xb0] sm:$0xff] }
 0x82e   : > { %v2678_v22 = vmul.f32 0.3275911, %v2677_v21  ;;  %v2691_v24 = vsub.f32 0.0, %v2677_v21 }
 0x830   : > { %v2679_v23 = vadd.f32 1.0, %v2678_v22  ;;  %v2692_v26 = vmul.f32 %v2691_v24, %v2677_v21  ;;  %v5176_v22 = vld [vmem:[%s7509_s2 + $0xb8] sm:$0xff] }
 0x831   : > { %v5208_v24 = vld [vmem:[%s7511_s4 + $0xd8] sm:$0xff] }
 0x832   : > { %6264 = vrcp.f32 %v2679_v23  ;;  %v2693_v29 = vmul.f32 1.442695, %v2692_v26  ;;  %v5207_v23 = vld [vmem:[%s7511_s4 + $0xd0] sm:$0xff] }
 0x833   : > { %v6140_v26 = vpack.c.bf16 %v5208_v24, %v5207_v23 }
 0x834   : > { %6266 = vpow2.f32 %v2693_v29  ;;  %v5225_v29 = vld [vmem:[%s7514_s5 + $0x80] sm:$0xff] }
 0x83c   : > { %v6265_v25 = vpop.eup %6264 }
 0x83d   : > { %v2682_v27 = vmul.f32 1.0614054, %v6265_v25 }
 0x83e   : > { %v6267_v39 = vpop.eup %6266 }
 0x83f   : > { %v2683_v28 = vadd.f32 -1.4531521, %v2682_v27  ;;  %v5177_v27 = vld [vmem:[%s7509_s2 + $0xc0] sm:$0xff] }
 0x841   : > { %v2684_v30 = vmul.f32 %v6265_v25, %v2683_v28  ;;  %v5178_v28 = vld [vmem:[%s7509_s2 + $0xc8] sm:$0xff] }
 0x843   : > { %v2685_v31 = vadd.f32 1.4214138, %v2684_v30  ;;  %v5226_v30 = vld [vmem:[%s7514_s5 + $0x88] sm:$0xff] }
 0x845   : > { %v2686_v33 = vmul.f32 %v6265_v25, %v2685_v31  ;;  %v6113_v31 = vpack.c.bf16 %v5178_v28, %v5177_v27  ;;  %v5191_v28 = vld [vmem:[%s7466_s6 + $0x6] ss:$0 sm:$0xff] }
 0x847   : > { %v2687_v34 = vadd.f32 -0.28449672, %v2686_v33  ;;  %v6149_v33 = vpack.c.bf16 %v5226_v30, %v5225_v29  ;;  %v5245_v29 = vld [vmem:[%s7468_s8 + $0x4] ss:$0 sm:$0xff] }
 0x849   : > { %v2688_v35 = vmul.f32 %v6265_v25, %v2687_v34  ;;  %v5179_v34 = vld [vmem:[%s7509_s2 + $0xd0] sm:$0xff] }
 0x84b   : > { %v2689_v37 = vadd.f32 0.2548296, %v2688_v35  ;;  %v5180_v35 = vld [vmem:[%s7509_s2 + $0xd8] sm:$0xff] }
 0x84d   : > { %v2690_v38 = vmul.f32 %v6265_v25, %v2689_v37  ;;  %v6110_v25 = vpack.c.bf16 %v5176_v22, %v5175_v19  ;;  %v5227_v37 = vld [vmem:[%s7514_s5 + $0x90] sm:$0xff] }
 0x84f   : > { %v2695_v40 = vmul.f32 %v6267_v39, %v2690_v38  ;;  %v5228_v38 = vld [vmem:[%s7514_s5 + $0x98] sm:$0xff]  ;;  %v6116_v39 = vpack.c.bf16 %v5180_v35, %v5179_v34 }
 0x851   : > { %v2696_v0 = vsub.f32 1.0, %v2695_v40  ;;  %v6152_v40 = vpack.c.bf16 %v5228_v38, %v5227_v37 }
 0x853   : > { %v2698_v36 = vsub.f32 0.0, %v2696_v0 }
 0x855   : > { %v2699_v41 = vsel %vm2697_vm3, %v2696_v0, %v2698_v36  ;;  %v5181_v0 = vld [vmem:[%s7509_s2 + $0xe0] sm:$0xff]  ;;  %v5182_v36 = vld [vmem:[%s7509_s2 + $0xe8] sm:$0xff] }
 0x856   : > { %v2700_v43 = vadd.f32 1.0, %v2699_v41  ;;  %v5233_v41 = vld [vmem:[%s7514_s5 + $0xc0] sm:$0xff] }
 0x858   : > { %v2701_v44 = vmul.f32 %v2700_v43, %v2675_v42  ;;  %v5234_v42 = vld [vmem:[%s7514_s5 + $0xc8] sm:$0xff]  ;;  %v6119_v43 = vpack.c.bf16 %v5182_v36, %v5181_v0  ;;  %v5218_v36 = vld [vmem:[%s7467_s7 + $0x5] ss:$0 sm:$0xff] }
 0x85a   : > { %5758 = vmatmul.mubr.f32.vlgmr.msra.gmra.mrb[20].mxu1 %v2701_v44  ;;  %v6161_v44 = vpack.c.bf16 %v5234_v42, %v5233_v41  ;;  %v5190_v42 = vld [vmem:[%s7466_s6 + $0x5] ss:$0 sm:$0xff] }
 0x85b   : > { %5812 = vmatprep.mubr.msk.f32.mxu1 %vm6359_vm1, %v6360_v20  ;;  %6126 = vmatpush3.bf16.msra.mxu1 %v6125_v60  ;;  %v5211_v60 = vld [vmem:[%s7511_s4 + $0xf0] sm:$0xff] }
 0x85c   : > { %6127 = vmatprep.subr.bf16.mxu1 %v6358_v12  ;;  %v6146_v63 = vpack.c.bf16 %v5212_v62, %v5211_v60 }
 0x85f   : > { %6129 = vmatpush3.bf16.msra.mxu1 %v6128_v3  ;;  %v5231_v3 = vld [vmem:[%s7514_s5 + $0xb0] sm:$0xff] }
 0x860   : > { %6136 = vmatprep.subr.bf16.mxu1 %v6358_v12 }
 0x92d   : > { %v2784_v45 = vpop.f32.mrb[20].mxu1 }
 0x92e   : > { %v2788_v47 = vadd.f32 %v2784_v45, %v6870_v32  ;;  %v5759_v48 = vpop.f32.mrb[21].mxu1  ;;  %v5170_v32 = vld [vmem:[%s7509_s2 + $0x88] sm:$0xff]  ;;  %v5183_v45 = vld [vmem:[%s7509_s2 + $0xf0] sm:$0xff] }
 0x92f   : > { %v6101_v58 = vpack.c.bf16 %v5170_v32, %v5169_v56  ;;  %v5236_v48 = vld [vmem:[%s7514_s5 + $0xd8] sm:$0xff] }
 0x930   : > { %v6964_v49 = vadd.f32 %v5164_v46, %v2788_v47  ;;  %v5184_v46 = vld [vmem:[%s7509_s2 + $0xf8] sm:$0xff]  ;;  %v5235_v47 = vld [vmem:[%s7514_s5 + $0xd0] sm:$0xff] }
 0x931   : > { %6102 = vmatpush3.bf16.msra.mxu0 %v6101_v58  ;;  %v5204_v56 = vld [vmem:[%s7511_s4 + $0xb8] sm:$0xff]  ;;  %v5210_v58 = vld [vmem:[%s7511_s4 + $0xe8] sm:$0xff] }
 0x932   : > { %v2801_v50 = vsel %vm601_vm0, %v6964_v49, 0.0  ;;  %6103 = vmatprep.subr.bf16.mxu0 %v6358_v12  ;;  %v6143_v59 = vpack.c.bf16 %v5210_v58, %v5209_v57 }
 0x933   : > { %2802 = vadd.xlane.f32.xlu0 %v2801_v50  ;;  %v6122_v50 = vpack.c.bf16 %v5184_v46, %v5183_v45  ;;  %v5220_v46 = vld [vmem:[%s7467_s7 + $0x7] ss:$0 sm:$0xff] }
 0x935   : > { %6105 = vmatpush3.bf16.msra.mxu0 %v6104_v61  ;;  %v5230_v61 = vld [vmem:[%s7514_s5 + $0xa8] sm:$0xff] }
 0x936   : > { %6106 = vmatprep.subr.bf16.mxu0 %v6358_v12  ;;  %v6155_v2 = vpack.c.bf16 %v5230_v61, %v5229_v1 }
 0x9c0   : > { %v2803_v51 = vpop.xlane.xlu0 %2802 }
 0x9c1   : > { %v2804_v52 = vmul.f32 0.03125, %v2803_v51  ;;  %v6164_v51 = vpack.c.bf16 %v5236_v48, %v5235_v47  ;;  %v5192_v48 = vld [vmem:[%s7466_s6 + $0x7] ss:$0 sm:$0xff] }
 0x9c3   : > { %v2805_v53 = vsub.f32 %v6964_v49, %v2804_v52  ;;  %v5201_v52 = vld [vmem:[%s7511_s4 + $0xa0] sm:$0xff] }
 0x9c5   : > { %v2806_v54 = vmul.f32 %v2805_v53, %v2805_v53 }
 0x9c7   : > { %v2807_v55 = vsel %vm601_vm0, %v2806_v54, 0.0 }
 0x9c8   : > { %2808 = vadd.xlane.f32.xlu1 %v2807_v55  ;;  %v5203_v55 = vld [vmem:[%s7511_s4 + $0xb0] sm:$0xff] }
 0x9c9   : > { %v6134_v32 = vpack.c.bf16 %v5204_v56, %v5203_v55 }
 0xa55   : > { %v2809_v4 = vpop.xlane.xlu1 %2808 }
 0xa56   : > { %v2810_v5 = vmul.f32 0.03125, %v2809_v4  ;;  %v5232_v4 = vld [vmem:[%s7514_s5 + $0xb8] sm:$0xff] }
 0xa58   : > { %v2811_v6 = vadd.f32 1e-05, %v2810_v5  ;;  %v6158_v5 = vpack.c.bf16 %v5232_v4, %v5231_v3 }
 0xa5a   : > { %6268 = vrsqrt.f32 %v2811_v6  ;;  %v5237_v6 = vld [vmem:[%s7514_s5 + $0xe0] sm:$0xff] }
 0xa64   : > { %v6269_v7 = vpop.eup %6268 }
 0xa65   : > { %v2813_v10 = vmul.f32 %v6269_v7, %v2805_v53  ;;  %v5202_v53 = vld [vmem:[%s7511_s4 + $0xa8] sm:$0xff]  ;;  %s7516_s4 = sld [smem:[#allocation18_spill]] }
 0xa66   : > { %v6131_v54 = vpack.c.bf16 %v5202_v53, %v5201_v52  ;;  %v5238_v7 = vld [vmem:[%s7514_s5 + $0xe8] sm:$0xff]  ;;  %v5246_v53 = vld [vmem:[%s7468_s8 + $0x5] ss:$0 sm:$0xff] }
 0xa67   : > { %v2820_v16 = vmul.f32 %v5167_v8, %v2813_v10  ;;  %v6167_v8 = vpack.c.bf16 %v5238_v7, %v5237_v6  ;;  %v5240_v10 = vld [vmem:[%s7514_s5 + $0xf8] sm:$0xff] }
 0xa68   : > { %v6170_v11 = vpack.c.bf16 %v5240_v10, %v5239_v9 }
 0xa69   : > { %v7019_v21 = vadd.f32 %v5168_v15, %v2820_v16  ;;  %v5189_v16 = vld [vmem:[%s7466_s6 + $0x4] ss:$0 sm:$0xff] }
 0xa6b   : > { %5769 = vmatmul.mubr.msk.f32.vlgmr.msra.gmra.mrb[30].mxu0 %vm601_vm0, %v7019_v21  ;;  %5813 = vmatmul.mubr.msk.f32.vlgmr.msra.gmra.mrb[22].mxu1 %vm601_vm0, %v7019_v21  ;;  %s7417_s5 = scalar_lea.hbm %s7516_s4, %s5307_s26 }
 0xa6c   : > { %6108 = vmatpush3.bf16.msra.mxu0 %v6107_v17  ;;  %6138 = vmatpush3.bf16.msra.mxu1 %v6137_v18 }
 0xa6d   : > { %6109 = vmatprep.subr.bf16.mxu0 %v6358_v12  ;;  %6139 = vmatprep.subr.bf16.mxu1 %v6358_v12 }
 0xa6e   : > { %5779 = vmatprep.mubr.msk.f32.mxu0 %vm6359_vm1, %v6360_v20  ;;  %5834 = vmatprep.mubr.msk.f32.mxu1 %vm6359_vm1, %v6360_v20 }
 0xa70   : > { %6111 = vmatpush3.bf16.msra.mxu0 %v6110_v25  ;;  %6141 = vmatpush3.bf16.msra.mxu1 %v6140_v26 }
 0xa71   : > { %6112 = vmatprep.subr.bf16.mxu0 %v6358_v12  ;;  %6148 = vmatprep.subr.bf16.mxu1 %v6358_v12 }
 0xa73   : > { %5780 = vmatmul.mubr.msk.f32.vlgmr.msra.gmra.mrb[32].mxu0 %vm601_vm0, %v7019_v21  ;;  %5835 = vmatmul.mubr.msk.f32.vlgmr.msra.gmra.mrb[24].mxu1 %vm601_vm0, %v7019_v21 }
 0xa74   : > { %6114 = vmatpush3.bf16.msra.mxu0 %v6113_v31  ;;  %6150 = vmatpush3.bf16.msra.mxu1 %v6149_v33 }
 0xa75   : > { %6115 = vmatprep.subr.bf16.mxu0 %v6358_v12  ;;  %6151 = vmatprep.subr.bf16.mxu1 %v6358_v12 }
 0xa76   : > { %5790 = vmatprep.mubr.msk.f32.mxu0 %vm6359_vm1, %v6360_v20  ;;  %5856 = vmatprep.mubr.msk.f32.mxu1 %vm6359_vm1, %v6360_v20 }
 0xa78   : > { %6117 = vmatpush3.bf16.msra.mxu0 %v6116_v39  ;;  %6153 = vmatpush3.bf16.msra.mxu1 %v6152_v40 }
 0xa79   : > { %6118 = vmatprep.subr.bf16.mxu0 %v6358_v12  ;;  %6160 = vmatprep.subr.bf16.mxu1 %v6358_v12 }
 0xa7b   : > { %5791 = vmatmul.mubr.msk.f32.vlgmr.msra.gmra.mrb[34].mxu0 %vm601_vm0, %v7019_v21  ;;  %5857 = vmatmul.mubr.msk.f32.vlgmr.msra.gmra.mrb[26].mxu1 %vm601_vm0, %v7019_v21 }
 0xa7c   : > { %6120 = vmatpush3.bf16.msra.mxu0 %v6119_v43  ;;  %6162 = vmatpush3.bf16.msra.mxu1 %v6161_v44 }
 0xa7d   : > { %6121 = vmatprep.subr.bf16.mxu0 %v6358_v12  ;;  %6163 = vmatprep.subr.bf16.mxu1 %v6358_v12 }
 0xa7e   : > { %5801 = vmatprep.mubr.msk.f32.mxu0 %vm6359_vm1, %v6360_v20  ;;  %5878 = vmatprep.mubr.msk.f32.mxu1 %vm6359_vm1, %v6360_v20 }
 0xa80   : > { %6123 = vmatpush3.bf16.msra.mxu0 %v6122_v50  ;;  %6165 = vmatpush3.bf16.msra.mxu1 %v6164_v51 }
 0xa81   : > { %6130 = vmatprep.subr.bf16.mxu0 %v6358_v12  ;;  %5892 = vmatprep.subr.mxu1 %v6360_v20 }
 0xa83   : > { %5802 = vmatmul.mubr.msk.f32.vlgmr.msra.gmra.mrb[36].mxu0 %vm601_vm0, %v7019_v21  ;;  %5879 = vmatmul.mubr.msk.f32.vlgmr.msra.gmra.mrb[28].mxu1 %vm601_vm0, %v7019_v21 }
 0xa84   : > { %6132 = vmatpush3.bf16.msra.mxu0 %v6131_v54  ;;  %5823 = vmatprep.mubr.msk.f32.mxu0 %vm6359_vm1, %v6360_v20 }
 0xa85   : > { %6133 = vmatprep.subr.bf16.mxu0 %v6358_v12  ;;  %5894 = vmatprep.mubr.msk.f32.mxu1 %vm6359_vm1, %v6360_v20 }
 0xa88   : > { %6135 = vmatpush3.bf16.msra.mxu0 %v6134_v32 }
 0xa89   : > { %6142 = vmatprep.subr.bf16.mxu0 %v6358_v12 }
 0xa8b   : > { %5824 = vmatmul.mubr.msk.f32.vlgmr.msra.gmra.mrb[38].mxu0 %vm601_vm0, %v7019_v21 }
 0xa8c   : > { %6144 = vmatpush3.bf16.msra.mxu0 %v6143_v59  ;;  %5845 = vmatprep.mubr.msk.f32.mxu0 %vm6359_vm1, %v6360_v20 }
 0xa8d   : > { %6145 = vmatprep.subr.bf16.mxu0 %v6358_v12 }
 0xa90   : > { %6147 = vmatpush3.bf16.msra.mxu0 %v6146_v63 }
 0xa91   : > { %6154 = vmatprep.subr.bf16.mxu0 %v6358_v12 }
 0xa93   : > { %5846 = vmatmul.mubr.msk.f32.vlgmr.msra.gmra.mrb[40].mxu0 %vm601_vm0, %v7019_v21 }
 0xa94   : > { %6156 = vmatpush3.bf16.msra.mxu0 %v6155_v2  ;;  %5867 = vmatprep.mubr.msk.f32.mxu0 %vm6359_vm1, %v6360_v20 }
 0xa95   : > { %6157 = vmatprep.subr.bf16.mxu0 %v6358_v12 }
 0xa98   : > { %6159 = vmatpush3.bf16.msra.mxu0 %v6158_v5 }
 0xa99   : > { %6166 = vmatprep.subr.bf16.mxu0 %v6358_v12 }
 0xa9b   : > { %5868 = vmatmul.mubr.msk.f32.vlgmr.msra.gmra.mrb[42].mxu0 %vm601_vm0, %v7019_v21 }
 0xa9c   : > { %6168 = vmatpush3.bf16.msra.mxu0 %v6167_v8  ;;  %5889 = vmatprep.mubr.msk.f32.mxu0 %vm6359_vm1, %v6360_v20 }
 0xa9d   : > { %6169 = vmatprep.subr.bf16.mxu0 %v6358_v12 }
 0xaa0   : > { %6171 = vmatpush3.bf16.msra.mxu0 %v6170_v11 }
 0xaa1   : > { %5902 = vmatprep.subr.mxu0 %v6360_v20 }
 0xaa3   : > { %5890 = vmatmul.mubr.msk.f32.vlgmr.msra.gmra.mrb[44].mxu0 %vm601_vm0, %v7019_v21  ;;  %v5219_v21 = vld [vmem:[%s7467_s7 + $0x6] ss:$0 sm:$0xff] }
 0xaa4   : > { %5904 = vmatprep.mubr.msk.f32.mxu0 %vm6359_vm1, %v6360_v20 }
 0xb3e   : > { %v2943_v14 = vpop.f32.mrb[30].mxu0  ;;  %v3269_v15 = vpop.f32.mrb[22].mxu1 }
 0xb3f   : > { %v3270_v17 = vadd.f32 %v5217_v13, %v3269_v15  ;;  %v5770_v18 = vpop.f32.mrb[31].mxu0  ;;  %v5814_v19 = vpop.f32.mrb[23].mxu1  ;;  %v2944_v22 = vadd.f32 %v5189_v16, %v2943_v14 }
 0xb41   : > { %5893 = vmatpush3.xpose.msk.msra.mxu1 %vm1605_vm2, %v3270_v17 }
 0xb42   : > { %5897 = vmatprep.subr.mxu1 %v6360_v20 }
 0xb44   : > { %5895 = vmatmul.mubr.msk.f32.vlgmr.msra.gmra.mrb[30].mxu1 %vm1605_vm2, %v2944_v22 }
 0xb45   : > { %5899 = vmatprep.mubr.msk.f32.mxu1 %vm6359_vm1, %v6360_v20 }
 0xb46   : > { %v3013_v23 = vpop.f32.mrb[32].mxu0  ;;  %v3409_v24 = vpop.f32.mrb[24].mxu1 }
 0xb47   : > { %v3410_v25 = vadd.f32 %v5219_v21, %v3409_v24  ;;  %v5781_v26 = vpop.f32.mrb[33].mxu0  ;;  %v5836_v27 = vpop.f32.mrb[25].mxu1  ;;  %v3014_v45 = vadd.f32 %v5190_v42, %v3013_v23 }
 0xb49   : > { %5903 = vmatpush3.xpose.msk.msra.mxu0 %vm1605_vm2, %v3410_v25 }
 0xb4a   : > { %5912 = vmatprep.subr.mxu0 %v6360_v20 }
 0xb4e   : > { %v3083_v30 = vpop.f32.mrb[34].mxu0  ;;  %v3595_v31 = vpop.f32.mrb[26].mxu1 }
 0xb4f   : > { %v3084_v33 = vadd.f32 %v5191_v28, %v3083_v30  ;;  %v3596_v34 = vadd.f32 %v5245_v29, %v3595_v31  ;;  %v5792_v35 = vpop.f32.mrb[35].mxu0  ;;  %v5858_v37 = vpop.f32.mrb[27].mxu1 }
 0xb50   : > { %v5247_v35 = vld [vmem:[%s7468_s8 + $0x6] ss:$0 sm:$0xff] }
 0xb51   : > { %5905 = vmatmul.mubr.msk.f32.vlgmr.msra.gmra.mrb[46].mxu0 %vm1605_vm2, %v3084_v33 }
 0xb52   : > { %5913 = vmatpush3.msra.mxu0 %v3596_v34  ;;  %5914 = vmatprep.mubr.msk.f32.mxu0 %vm6359_vm1, %v6360_v20 }
 0xb53   : > { %5922 = vmatprep.subr.mxu0 %v6360_v20 }
 0xb56   : > { %v3153_v38 = vpop.f32.mrb[36].mxu0  ;;  %v7220_v39 = vpop.f32.mrb[28].mxu1 }
 0xb57   : > { %v5803_v40 = vpop.f32.mrb[37].mxu0  ;;  %v5880_v0 = vpop.f32.mrb[29].mxu1  ;;  %v3154_v52 = vadd.f32 %v5192_v48, %v3153_v38 }
 0xb58   : > { %v3736_v40 = vadd.f32 %v5247_v35, %v7220_v39  ;;  %v5278_v35 = vld [vmem:[%s7472_s12 + $0x1] ss:$0 sm:$0xff] }
 0xb5e   : > { %v3339_v41 = vpop.f32.mrb[38].mxu0 }
 0xb5f   : > { %v3340_v43 = vadd.f32 %v5218_v36, %v3339_v41  ;;  %v5825_v44 = vpop.f32.mrb[39].mxu0 }
 0xb61   : > { %5898 = vmatpush3.xpose.msk.msra.mxu1 %vm1605_vm2, %v3340_v43  ;;  %v5248_v43 = vld [vmem:[%s7468_s8 + $0x7] ss:$0 sm:$0xff] }
 0xb62   : > { %5907 = vmatprep.subr.mxu1 %v6360_v20 }
 0xb64   : > { %5900 = vmatmul.mubr.msk.f32.vlgmr.msra.gmra.mrb[32].mxu1 %vm1605_vm2, %v3014_v45 }
 0xb65   : > { %5909 = vmatprep.mubr.msk.f32.mxu1 %vm6359_vm1, %v6360_v20 }
 0xb66   : > { %v3479_v47 = vpop.f32.mrb[40].mxu0 }
 0xb67   : > { %v3480_v50 = vadd.f32 %v5220_v46, %v3479_v47  ;;  %v5847_v51 = vpop.f32.mrb[41].mxu0 }
 0xb68   : > { %v5266_v51 = vld [vmem:[%s7469_s9 + $0x28] sm:$0xff] }
 0xb69   : > { %5908 = vmatpush3.xpose.msk.msra.mxu1 %vm1605_vm2, %v3480_v50  ;;  %v5265_v50 = vld [vmem:[%s7469_s9 + $0x20] sm:$0xff] }
 0xb6a   : > { %5917 = vmatprep.subr.mxu1 %v6360_v20 }
 0xb6c   : > { %5910 = vmatmul.mubr.msk.f32.vlgmr.msra.gmra.mrb[34].mxu1 %vm1605_vm2, %v3154_v52  ;;  %v5267_v52 = vld [vmem:[%s7469_s9 + $0x30] sm:$0xff] }
 0xb6d   : > { %5919 = vmatprep.mubr.msk.f32.mxu1 %vm6359_vm1, %v6360_v20 }
 0xb6e   : > { %v3665_v54 = vpop.f32.mrb[42].mxu0 }
 0xb6f   : > { %v3666_v55 = vadd.f32 %v5246_v53, %v3665_v54  ;;  %v5869_v56 = vpop.f32.mrb[43].mxu0 }
 0xb71   : > { %5918 = vmatpush3.msra.mxu1 %v3666_v55 }
 0xb72   : > { %5927 = vmatprep.subr.mxu1 %v6360_v20 }
 0xb76   : > { %v7248_v32 = vpop.f32.mrb[44].mxu0 }
 0xb77   : > { %v5891_v57 = vpop.f32.mrb[45].mxu0  ;;  %v3806_v46 = vadd.f32 %v5248_v43, %v7248_v32  ;;  %v5268_v32 = vld [vmem:[%s7469_s9 + $0x38] sm:$0xff]  ;;  %v5290_v43 = vld [vmem:[%s7475_s15 + $0xa0] sm:$0xff] }
 0xc17   : > { %v3881_v58 = vpop.f32.mrb[30].mxu1 }
 0xc18   : > { %v4113_v59 = vmul.f32 0.35355338, %v3881_v58  ;;  %v5896_v60 = vpop.f32.mrb[31].mxu1 }
 0xc1a   : > { %v4117_v62 = vsel %vm1605_vm2, %v4113_v59, -inf }
 0xc1b   : > { %4118 = vmax.xlane.f32.xlu0 %v4117_v62 }
 0xc24   : > { %v4033_v63 = vpop.f32.mrb[46].mxu0 }
 0xc25   : > { %v4115_v1 = vmul.f32 0.35355338, %v4033_v63  ;;  %v5906_v61 = vpop.f32.mrb[47].mxu0 }
 0xc27   : > { %v4123_v2 = vsel %vm1605_vm2, %v4115_v1, -inf }
 0xc28   : > { %4124 = vmax.xlane.f32.xlu0 %v4123_v2 }
 0xc37   : > { %v3957_v3 = vpop.f32.mrb[32].mxu1 }
 0xc38   : > { %v4114_v4 = vmul.f32 0.35355338, %v3957_v3  ;;  %v5901_v5 = vpop.f32.mrb[33].mxu1 }
 0xc3a   : > { %v4120_v6 = vsel %vm1605_vm2, %v4114_v4, -inf }
 0xc3b   : > { %4121 = vmax.xlane.f32.xlu1 %v4120_v6 }
 0xc3f   : > { %v4109_v7 = vpop.f32.mrb[34].mxu1 }
 0xc40   : > { %v4116_v8 = vmul.f32 0.35355338, %v4109_v7  ;;  %v5911_v9 = vpop.f32.mrb[35].mxu1 }
 0xc42   : > { %v4126_v10 = vsel %vm1605_vm2, %v4116_v8, -inf }
 0xc43   : > { %4127 = vmax.xlane.f32.xlu1 %v4126_v10 }
 0xca8   : > { %v4119_v11 = vpop.xlane.xlu0 %4118 }
 0xca9   : > { %v4129_v13 = vsub.f32 %v4113_v59, %v4119_v11 }
 0xcab   : > { %v4133_v14 = vmul.f32 1.442695, %v4129_v13 }
 0xcad   : > { %6270 = vpow2.f32 %v4133_v14 }
 0xcb5   : > { %v4125_v15 = vpop.xlane.xlu0 %4124 }
 0xcb6   : > { %v4131_v16 = vsub.f32 %v4115_v1, %v4125_v15 }
 0xcb7   : > { %v6271_v17 = vpop.eup %6270 }
 0xcb8   : > { %v4137_v18 = vmul.f32 1.442695, %v4131_v16  ;;  %v4141_v19 = vsel %vm1605_vm2, %v6271_v17, 0.0 }
 0xcb9   : > { %4142 = vadd.xlane.f32.xlu0 %v4141_v19 }
 0xcba   : > { %6272 = vpow2.f32 %v4137_v18 }
 0xcc4   : > { %v6273_v22 = vpop.eup %6272 }
 0xcc5   : > { %v4147_v21 = vsel %vm1605_vm2, %v6273_v22, 0.0 }
 0xcc6   : > { %4148 = vadd.xlane.f32.xlu0 %v4147_v21 }
 0xcc8   : > { %v4122_v23 = vpop.xlane.xlu1 %4121 }
 0xcc9   : > { %v4130_v24 = vsub.f32 %v4114_v4, %v4122_v23  ;;  %v5279_v23 = vld [vmem:[%s7473_s13 + $0x20] sm:$0xff] }
 0xccb   : > { %v4135_v25 = vmul.f32 1.442695, %v4130_v24 }
 0xccd   : > { %6274 = vpow2.f32 %v4135_v25  ;;  %v5281_v25 = vld [vmem:[%s7473_s13 + $0x30] sm:$0xff] }
 0xcd0   : > { %v4128_v26 = vpop.xlane.xlu1 %4127 }
 0xcd1   : > { %v4132_v27 = vsub.f32 %v4116_v8, %v4128_v26  ;;  %v5282_v26 = vld [vmem:[%s7473_s13 + $0x38] sm:$0xff] }
 0xcd3   : > { %v4139_v28 = vmul.f32 1.442695, %v4132_v27  ;;  %v6176_v27 = vpack.c.bf16 %v5282_v26, %v5281_v25 }
 0xcd5   : > { %6276 = vpow2.f32 %v4139_v28 }
 0xcd7   : > { %v6275_v29 = vpop.eup %6274 }
 0xcd8   : > { %v4144_v30 = vsel %vm1605_vm2, %v6275_v29, 0.0 }
 0xcd9   : > { %4145 = vadd.xlane.f32.xlu1 %v4144_v30 }
 0xcdf   : > { %v6277_v31 = vpop.eup %6276 }
 0xce0   : > { %v4150_v33 = vsel %vm1605_vm2, %v6277_v31, 0.0 }
 0xce1   : > { %4151 = vadd.xlane.f32.xlu1 %v4150_v33  ;;  %v5277_v33 = vld [vmem:[%s7471_s11 + $0x1] ss:$0 sm:$0xff] }
 0xd46   : > { %v4143_v34 = vpop.xlane.xlu0 %4142 }
 0xd47   : > { %6278 = vrcp.f32 %v4143_v34 }
 0xd51   : > { %v6279_v37 = vpop.eup %6278 }
 0xd52   : > { %v4157_v38 = vmul.f32 %v6279_v37, %v6271_v17 }
 0xd53   : > { %v4149_v0 = vpop.xlane.xlu0 %4148 }
 0xd54   : > { %6280 = vrcp.f32 %v4149_v0  ;;  %5915 = vmatmul.mubr.msk.f32.vlgmr.msra.gmra.mrb[48].mxu0 %vm1605_vm2, %v4157_v38  ;;  %v5287_v0 = vld [vmem:[%s7475_s15 + $0x88] sm:$0xff] }
 0xd55   : > { %5923 = vmatpush3.msra.mxu0 %v3736_v40  ;;  %5924 = vmatprep.mubr.msk.f32.mxu0 %vm6359_vm1, %v6360_v20  ;;  %v5286_v40 = vld [vmem:[%s7475_s15 + $0x80] sm:$0xff] }
 0xd56   : > { %5932 = vmatprep.subr.mxu0 %v6360_v20 }
 0xd5e   : > { %v6281_v36 = vpop.eup %6280 }
 0xd5f   : > { %v4159_v41 = vmul.f32 %v6281_v36, %v6273_v22  ;;  %v6179_v36 = vpack.c.bf16 %v5287_v0, %v5286_v40 }
 0xd61   : > { %5925 = vmatmul.mubr.msk.f32.vlgmr.msra.gmra.mrb[50].mxu0 %vm1605_vm2, %v4159_v41  ;;  %v5288_v41 = vld [vmem:[%s7475_s15 + $0x90] sm:$0xff] }
 0xd62   : > { %5934 = vmatprep.mubr.msk.f32.mxu0 %vm6359_vm1, %v6360_v20  ;;  %5933 = vmatpush3.msra.mxu0 %v5265_v50  ;;  %v5294_v50 = vld [vmem:[%s7475_s15 + $0xc0] sm:$0xff] }
 0xd63   : > { %5942 = vmatprep.subr.mxu0 %v6360_v20 }
 0xd66   : > { %v4146_v42 = vpop.xlane.xlu1 %4145 }
 0xd67   : > { %6282 = vrcp.f32 %v4146_v42  ;;  %v5289_v42 = vld [vmem:[%s7475_s15 + $0x98] sm:$0xff] }
 0xd6e   : > { %v4152_v39 = vpop.xlane.xlu1 %4151 }
 0xd6f   : > { %6284 = vrcp.f32 %v4152_v39  ;;  %v6182_v39 = vpack.c.bf16 %v5289_v42, %v5288_v41  ;;  %v5304_v42 = vld [vmem:[%s7477_s17] ss:$0 sm:$0xff] }
 0xd71   : > { %v6283_v44 = vpop.eup %6282 }
 0xd72   : > { %v4158_v45 = vmul.f32 %v6283_v44, %v6275_v29  ;;  %v5291_v44 = vld [vmem:[%s7475_s15 + $0xa8] sm:$0xff] }
 0xd74   : > { %5920 = vmatmul.mubr.msk.f32.vlgmr.msra.gmra.mrb[36].mxu1 %vm1605_vm2, %v4158_v45  ;;  %v6185_v45 = vpack.c.bf16 %v5291_v44, %v5290_v43  ;;  %v5305_v43 = vld [vmem:[%s7515_s29] ss:$0 sm:$0xff] }
 0xd75   : > { %5928 = vmatpush3.msra.mxu1 %v3806_v46  ;;  %5929 = vmatprep.mubr.msk.f32.mxu1 %vm6359_vm1, %v6360_v20  ;;  %v5292_v46 = vld [vmem:[%s7475_s15 + $0xb0] sm:$0xff] }
 0xd76   : > { %5937 = vmatprep.subr.mxu1 %v6360_v20 }
 0xd79   : > { %v6285_v47 = vpop.eup %6284 }
 0xd7a   : > { %v4160_v48 = vmul.f32 %v6285_v47, %v6277_v31  ;;  %v5293_v47 = vld [vmem:[%s7475_s15 + $0xb8] sm:$0xff] }
 0xd7c   : > { %5930 = vmatmul.mubr.msk.f32.vlgmr.msra.gmra.mrb[38].mxu1 %vm1605_vm2, %v4160_v48  ;;  %v6188_v48 = vpack.c.bf16 %v5293_v47, %v5292_v46 }
 0xd7d   : > { %5939 = vmatprep.mubr.msk.f32.mxu1 %vm6359_vm1, %v6360_v20  ;;  %5938 = vmatpush3.msra.mxu1 %v5266_v51  ;;  %v5295_v51 = vld [vmem:[%s7475_s15 + $0xc8] sm:$0xff] }
 0xd7e   : > { %5947 = vmatprep.subr.mxu1 %v6360_v20 }
 0xe27   : > { %v4230_v53 = vpop.f32.mrb[48].mxu0 }
 0xe28   : > { %v5916_v54 = vpop.f32.mrb[49].mxu0  ;;  %5935 = vmatmul.mubr.msk.f32.vlgmr.msra.gmra.mrb[52].mxu0 %vm1605_vm2, %v4230_v53  ;;  %v5296_v53 = vld [vmem:[%s7475_s15 + $0xd0] sm:$0xff] }
 0xe29   : > { %5943 = vmatpush3.msra.mxu0 %v5267_v52  ;;  %5944 = vmatprep.mubr.msk.f32.mxu0 %vm6359_vm1, %v6360_v20  ;;  %v6191_v52 = vpack.c.bf16 %v5295_v51, %v5294_v50  ;;  %v5297_v54 = vld [vmem:[%s7475_s15 + $0xd8] sm:$0xff] }
 0xe2a   : > { %6172 = vmatprep.subr.bf16.mxu0 %v6358_v12 }
 0xe34   : > { %v4376_v55 = vpop.f32.mrb[50].mxu0 }
 0xe35   : > { %v5926_v56 = vpop.f32.mrb[51].mxu0  ;;  %5945 = vmatmul.mubr.msk.f32.vlgmr.msra.gmra.mrb[54].mxu0 %vm1605_vm2, %v4376_v55  ;;  %v6194_v55 = vpack.c.bf16 %v5297_v54, %v5296_v53 }
 0xe36   : > { %5960 = vmatprep.mubr.msk.f32.mxu0 %vm6359_vm1, %v6360_v20  ;;  %v5298_v56 = vld [vmem:[%s7475_s15 + $0xe0] sm:$0xff] }
 0xe47   : > { %v4303_v57 = vpop.f32.mrb[36].mxu1 }
 0xe48   : > { %v5921_v58 = vpop.f32.mrb[37].mxu1  ;;  %5940 = vmatmul.mubr.msk.f32.vlgmr.msra.gmra.mrb[40].mxu1 %vm1605_vm2, %v4303_v57 }
 0xe49   : > { %5948 = vmatpush3.msra.mxu1 %v5268_v32  ;;  %5949 = vmatprep.mubr.msk.f32.mxu1 %vm6359_vm1, %v6360_v20  ;;  %v5299_v32 = vld [vmem:[%s7475_s15 + $0xe8] sm:$0xff]  ;;  %v5300_v58 = vld [vmem:[%s7475_s15 + $0xf0] sm:$0xff] }
 0xe4a   : > { %6178 = vmatprep.subr.bf16.mxu1 %v6358_v12  ;;  %v6197_v57 = vpack.c.bf16 %v5299_v32, %v5298_v56 }
 0xe4f   : > { %v4449_v59 = vpop.f32.mrb[38].mxu1 }
 0xe50   : > { %v5931_v60 = vpop.f32.mrb[39].mxu1  ;;  %5950 = vmatmul.mubr.msk.f32.vlgmr.msra.gmra.mrb[42].mxu1 %vm1605_vm2, %v4449_v59  ;;  %v5301_v59 = vld [vmem:[%s7475_s15 + $0xf8] sm:$0xff] }
 0xe51   : > { %5995 = vmatprep.mubr.msk.f32.mxu1 %vm6359_vm1, %v6360_v20  ;;  %v5274_v20 = vld [vmem:[%s7470_s10 + $0x1] ss:$0 sm:$0xff]  ;;  %6180 = vmatpush3.bf16.msra.mxu1 %v6179_v36  ;;  %v6200_v60 = vpack.c.bf16 %v5301_v59, %v5300_v58 }
 0xe52   : > { %6181 = vmatprep.subr.bf16.mxu1 %v6358_v12 }
 0xe55   : > { %6183 = vmatpush3.bf16.msra.mxu1 %v6182_v39 }
 0xe56   : > { %6184 = vmatprep.subr.bf16.mxu1 %v6358_v12 }
 0xe59   : > { %6186 = vmatpush3.bf16.msra.mxu1 %v6185_v45 }
 0xe5a   : > { %6187 = vmatprep.subr.bf16.mxu1 %v6358_v12 }
 0xe5d   : > { %6189 = vmatpush3.bf16.msra.mxu1 %v6188_v48 }
 0xe5e   : > { %6190 = vmatprep.subr.bf16.mxu1 %v6358_v12 }
 0xe61   : > { %6192 = vmatpush3.bf16.msra.mxu1 %v6191_v52 }
 0xe62   : > { %6193 = vmatprep.subr.bf16.mxu1 %v6358_v12 }
 0xe65   : > { %6195 = vmatpush3.bf16.msra.mxu1 %v6194_v55 }
 0xe66   : > { %6196 = vmatprep.subr.bf16.mxu1 %v6358_v12 }
 0xe69   : > { %6198 = vmatpush3.bf16.msra.mxu1 %v6197_v57 }
 0xe6a   : > { %6199 = vmatprep.subr.bf16.mxu1 %v6358_v12 }
 0xe6d   : > { %6201 = vmatpush3.bf16.msra.mxu1 %v6200_v60 }
 0xefb   : > { %v4527_v62 = vpop.f32.mrb[52].mxu0 }
 0xefc   : > { %v5936_v63 = vpop.f32.mrb[53].mxu0  ;;  %v4750_v3 = vsel %vm601_vm0, %v4527_v62, 0.0  ;;  %v5284_v62 = vld [vmem:[%s7474_s14 + $0x1] ss:$0 sm:$0xff] }
 0xf08   : > { %v4673_v1 = vpop.f32.mrb[54].mxu0 }
 0xf09   : > { %v5946_v61 = vpop.f32.mrb[55].mxu0  ;;  %v4753_v7 = vsel %vm601_vm0, %v4673_v1, 0.0 }
 0xf1b   : > { %v4600_v2 = vpop.f32.mrb[40].mxu1 }
 0xf1c   : > { %v4751_v4 = vsel %vm601_vm0, %v4600_v2, 0.0  ;;  %v5941_v5 = vpop.f32.mrb[41].mxu1 }
 0xf1d   : > { %v4752_v6 = vadd.f32 %v4751_v4, %v4750_v3 }
 0xf1f   : > { %v4754_v8 = vadd.f32 %v4753_v7, %v4752_v6 }
 0xf23   : > { %v4746_v9 = vpop.f32.mrb[42].mxu1 }
 0xf24   : > { %v4755_v10 = vsel %vm601_vm0, %v4746_v9, 0.0  ;;  %v5951_v11 = vpop.f32.mrb[43].mxu1 }
 0xf25   : > { %v4756_v13 = vadd.f32 %v4755_v10, %v4754_v8 }
 0xf27   : > { %v4757_v14 = vadd.f32 %v4756_v13, %v6964_v49  ;;  %v5280_v49 = vld [vmem:[%s7473_s13 + $0x28] sm:$0xff] }
 0xf28   : > { %v6173_v24 = vpack.c.bf16 %v5280_v49, %v5279_v23 }
 0xf29   : > { %v7316_v15 = vadd.f32 %v5274_v20, %v4757_v14 }
 0xf2a   : > { %6174 = vmatpush3.bf16.msra.mxu0 %v6173_v24 }
 0xf2b   : > { %v4771_v16 = vsel %vm601_vm0, %v7316_v15, 0.0  ;;  %6175 = vmatprep.subr.bf16.mxu0 %v6358_v12 }
 0xf2c   : > { %4772 = vadd.xlane.f32.xlu0 %v4771_v16 }
 0xf2e   : > { %6177 = vmatpush3.bf16.msra.mxu0 %v6176_v27 }
 0xfb9   : > { %v4773_v17 = vpop.xlane.xlu0 %4772 }
 0xfba   : > { %v4774_v18 = vmul.f32 0.03125, %v4773_v17 }
 0xfbc   : > { %v4775_v19 = vsub.f32 %v7316_v15, %v4774_v18 }
 0xfbe   : > { %v4776_v22 = vmul.f32 %v4775_v19, %v4775_v19 }
 0xfc0   : > { %v4777_v21 = vsel %vm601_vm0, %v4776_v22, 0.0 }
 0xfc1   : > { %4778 = vadd.xlane.f32.xlu1 %v4777_v21 }
0x104e   : > { %v4779_v28 = vpop.xlane.xlu1 %4778 }
0x104f   : > { %v4780_v29 = vmul.f32 0.03125, %v4779_v28  ;;  %v5303_v28 = vld [vmem:[%s7476_s16 + $0x1] ss:$0 sm:$0xff] }
0x1051   : > { %v4781_v30 = vadd.f32 1e-05, %v4780_v29 }
0x1053   : > { %6286 = vrsqrt.f32 %v4781_v30 }
0x105d   : > { %v6287_v31 = vpop.eup %6286 }
0x105e   : > { %v4783_v34 = vmul.f32 %v6287_v31, %v4775_v19 }
0x1060   : > { %v4790_v37 = vmul.f32 %v5277_v33, %v4783_v34 }
0x1062   : > { %v4797_v38 = vadd.f32 %v5278_v35, %v4790_v37 }
0x1064   : > { %5961 = vmatmul.mubr.msk.f32.vlgmr.msra.gmra.mrb[56].mxu0 %vm601_vm0, %v4797_v38 }
0x1137   : > { %v4880_v63 = vpop.f32.mrb[56].mxu0 }
0x1138   : > { %v4881_v1 = vadd.f32 %v5284_v62, %v4880_v63  ;;  %v5962_v61 = vpop.f32.mrb[57].mxu0 }
0x113a   : > { %v4885_v2 = vmul.f32 0.70710677, %v4881_v1  ;;  %v4884_v24 = vmul.f32 0.5, %v4881_v1 }
0x113c   : > { %v4886_v3 = vand.u32 2147483647, %v4885_v2  ;;  %vm4906_vm4 = vcmp.ge.f32.partialorder %v4885_v2, 0.0 }
0x113e   : > { %v4887_v12 = vmul.f32 0.3275911, %v4886_v3  ;;  %v4900_v5 = vsub.f32 0.0, %v4886_v3 }
0x1140   : > { %v4888_v4 = vadd.f32 1.0, %v4887_v12  ;;  %v4901_v7 = vmul.f32 %v4900_v5, %v4886_v3 }
0x1142   : > { %6288 = vrcp.f32 %v4888_v4  ;;  %v4902_v10 = vmul.f32 1.442695, %v4901_v7 }
0x1144   : > { %6290 = vpow2.f32 %v4902_v10 }
0x114c   : > { %v6289_v6 = vpop.eup %6288 }
0x114d   : > { %v4891_v8 = vmul.f32 1.0614054, %v6289_v6 }
0x114e   : > { %v6291_v19 = vpop.eup %6290 }
0x114f   : > { %v4892_v9 = vadd.f32 -1.4531521, %v4891_v8 }
0x1151   : > { %v4893_v11 = vmul.f32 %v6289_v6, %v4892_v9 }
0x1153   : > { %v4894_v13 = vadd.f32 1.4214138, %v4893_v11 }
0x1155   : > { %v4895_v20 = vmul.f32 %v6289_v6, %v4894_v13 }
0x1157   : > { %v4896_v14 = vadd.f32 -0.28449672, %v4895_v20 }
0x1159   : > { %v4897_v16 = vmul.f32 %v6289_v6, %v4896_v14 }
0x115b   : > { %v4898_v17 = vadd.f32 0.2548296, %v4897_v16 }
0x115d   : > { %v4899_v18 = vmul.f32 %v6289_v6, %v4898_v17 }
0x115f   : > { %v4904_v22 = vmul.f32 %v6291_v19, %v4899_v18 }
0x1161   : > { %v4905_v21 = vsub.f32 1.0, %v4904_v22 }
0x1163   : > { %v4907_v23 = vsub.f32 0.0, %v4905_v21 }
0x1165   : > { %v4908_v49 = vsel %vm4906_vm4, %v4905_v21, %v4907_v23 }
0x1166   : > { %v4909_v25 = vadd.f32 1.0, %v4908_v49 }
0x1168   : > { %v4910_v26 = vmul.f32 %v4909_v25, %v4884_v24 }
0x116a   : > { %5996 = vmatmul.mubr.f32.vlgmr.msra.gmra.mrb[44].mxu1 %v4910_v26 }
0x123d   : > { %v4994_v27 = vpop.f32.mrb[44].mxu1 }
0x123e   : > { %v4998_v29 = vadd.f32 %v4994_v27, %v7316_v15  ;;  %v5997_v30 = vpop.f32.mrb[45].mxu1 }
0x1240   : > { %v5007_v31 = vadd.f32 %v5303_v28, %v4998_v29 }
0x1242   : > { %v5010_v33 = vsel %vm601_vm0, %v5007_v31, 0.0 }
0x1243   : > { %5011 = vadd.xlane.f32.xlu0 %v5010_v33 }
0x12d0   : > { %v5012_v34 = vpop.xlane.xlu0 %5011 }
0x12d1   : > { %v5013_v35 = vmul.f32 0.03125, %v5012_v34 }
0x12d3   : > { %v5014_v37 = vsub.f32 %v5007_v31, %v5013_v35 }
0x12d5   : > { %v5015_v38 = vmul.f32 %v5014_v37, %v5014_v37 }
0x12d7   : > { %v5016_v40 = vsel %vm601_vm0, %v5015_v38, 0.0 }
0x12d8   : > { %5017 = vadd.xlane.f32.xlu1 %v5016_v40 }
0x1365   : > { %v5018_v0 = vpop.xlane.xlu1 %5017 }
0x1366   : > { %v5019_v36 = vmul.f32 0.03125, %v5018_v0 }
0x1368   : > { %v5020_v41 = vadd.f32 1e-05, %v5019_v36 }
0x136a   : > { %6292 = vrsqrt.f32 %v5020_v41 }
0x1374   : > { %v6293_v15 = vpop.eup %6292 }
0x1375   : > { %v5022_v39 = vmul.f32 %v6293_v15, %v5014_v37 }
0x1377   : > { %v5029_v44 = vmul.f32 %v5304_v42, %v5022_v39 }
0x1379   : > { %v5036_v45 = vadd.f32 %v5305_v43, %v5029_v44 }
0x137b   : > { %5037 = vst.msk [vmem:[%s593_s28] sm:$0xff] %vm601_vm0, %v5036_v45 }
0x137c   : > { %6307 = shalt.err (!%p6304_p3)
}
0x137d   : > { %s6308_s2 = scalar_lea.hbm %s7417_s5, 128  ;;  %s6312_s29 = scalar_lea.hbm %s7516_s4, 256 }
0x137e   : > { %p6309_p4 = scmp.ne.s32.totalorder %s7417_s5, %s6308_s2  ;;  %p6313_p9 = scmp.lt.u32.totalorder %s7417_s5, %s7516_s4 }
0x137f   : > { %p6314_p10 = scmp.lt.u32.totalorder %s6312_s29, %s6308_s2  ;;  %p6316_p12 = scmp.lt.u32.totalorder %s6308_s2, %s7417_s5 }
0x1380   : > { %p6310_p7 = pnand %p6309_p4, %p6500_p5 }
0x1381   : > { %p6315_p11 = por %p6314_p10, %p6313_p9 }
0x1382   : > { %p6311_p8 = pneg %p6310_p7 }
0x1383   : > { %p6317_p13 = por %p6316_p12, %p6315_p11 }
0x1385   : > { %p6318_p0 = pnand %p6317_p13, %p6311_p8 }
0x1387   : > { %6321 = shalt.err (!%p6318_p0)
}
0x1388   : > { %6202 = dma.vmem_to_hbm [thread:$0]  (%p6500_p5), %s7419_s22, 128, %s7417_s5, %s5039_s23  }
0x1389 PF: > { %s7517_s0 = sld [smem:[#allocation7_spill]]  ;;  %s7518_s24 = sld [smem:[#allocation5_spill]] }
0x138f   : > { %p6208_p1 = scmp.ge.s32.totalorder %s7517_s0, 2  ;;  %s5064_s19 = sand.u32 1, %s7518_s24  }
0x1390   : > { %s5065_s20 = scalar_lea.sflag [#allocation3], %s5064_s19 }
0x1391   : > { %p6205_p2 = pnand %p6208_p1, %p6504_p6 }
0x1393   : > { %6339 = dma.done.wait (!%p6205_p2), %s5065_s20, 128  }
0x1394   : > { %6341 = vsyncadd (!%p6205_p2), %s5065_s20, 4294967168  ;;  %s7520_s21 = sld [smem:[#allocation8_spill]]  ;;  %s7521_s2 = sld [smem:[#allocation6_spill]] }
0x1395   : > { %s7522_s20 = sld [smem:[#allocation9_spill]]  ;;  %s7523_s0 = smov %s6348_s30 }
0x139a   : > { %p29_p3 = scmp.ge.s32.totalorder %s7520_s21, 4   ;;  %s7524_s30 = smov %s7521_s2 }
0x139c   :  { %31 = sbr.rel (!%p29_p3) target bundleno = 12 (0xc), region = 147 }
0x13a3   :  { %5070 = vsyncpa [#allocation3], 1 }
0x13a4   :  { %5072 = vsyncpa [#allocation3 + $0x1], 1 }

</bundles_post_ra>
